<compile_context>
chip_gen: v6e
topology: v6e:2x2x1
jax: 0.10.0
libtpu: 0.0.40
codegen_flags: <defaults>
</compile_context>

<pallas_src>
import jax
import jax.numpy as jnp
from jax import lax
from jax.experimental import pallas as pl
from jax.experimental.pallas import tpu as pltpu

MAX_MOVES = 4                  # max_moves
B = 2                          # batch
H = W = 8                      # board size implied by the 8*6*6 flatten after both convs
C1, C2 = 4, 8                  # conv channel counts
PA_DIM = MAX_MOVES * 2 * 64    # possible_actions width (= 512 for max_moves=4)
CONV1_OUT = C1 * H * W         # 256
FLAT = C2 * 6 * 6              # 288
EPS = 1e-5

_VMEM = pl.BlockSpec(memory_space=pltpu.MemorySpace.VMEM)
_ANY = pl.BlockSpec(memory_space=pl.ANY)


def _dqn_kernel(x_ref, pa_ref,
                t1_ref, bc1_ref, t2_ref, bc2_ref,
                w1a_hbm, w1b_hbm, bl1_ref, wl2_ref, bl2_ref,
                out_ref,
                w1a_s, w1b_s, sem):
    # x_ref: (B, 64) f32   pa_ref: (B, 512) f32
    # t1:  (64, 256) bf16   conv1(pad=1)+BN1-scale Toeplitz;  bc1: (1, 256) f32 folded bias
    # t2:  (256, 288) bf16  conv2(valid)+BN2-scale Toeplitz (CHW flatten in cols); bc2: (1, 288) f32
    # w1a: (288, 288) bf16 in HBM (lin1 rows for conv features, torch CHW row order)
    # w1b: (512, 288) bf16 in HBM (lin1 rows for possible_actions -> replaces torch.cat)
    # wl2: (288, 4) bf16    bl1/bl2: f32 biases
    # w1a_s/w1b_s: VMEM landing buffers for the manual lin1 weight DMAs; sem: DMA sems (2,)

    # Kick off the big lin1 weight DMAs so they overlap with the two small conv matmuls below.
    cp_a = pltpu.make_async_copy(w1a_hbm, w1a_s, sem.at[0])
    cp_b = pltpu.make_async_copy(w1b_hbm, w1b_s, sem.at[1])
    cp_a.start()
    cp_b.start()

    # conv1 + bn1 + relu as a single (B,64)@(64,256) MXU matmul (zero-padding & BN scale baked in).
    h1 = jnp.dot(x_ref[...].astype(jnp.bfloat16), t1_ref[...],
                 preferred_element_type=jnp.float32) + bc1_ref[...]
    h1 = jnp.maximum(h1, 0.0)                                           # (B, 256) f32

    # conv2 + bn2 + relu + flatten as a single (B,256)@(256,288) matmul (CHW flatten in T2 cols).
    h2 = jnp.dot(h1.astype(jnp.bfloat16), t2_ref[...],
                 preferred_element_type=jnp.float32) + bc2_ref[...]
    h2 = jnp.maximum(h2, 0.0)                                           # (B, 288) f32

    # lin1 weights must be resident now; DMA has been in flight during the conv matmuls.
    cp_a.wait()
    cp_b.wait()

    # lin1 (weight split at row 288: no concat is ever materialized) + relu, lin2, softmax.
    pre = jnp.dot(h2.astype(jnp.bfloat16), w1a_s[...], preferred_element_type=jnp.float32)
    pre = pre + jnp.dot(pa_ref[...].astype(jnp.bfloat16), w1b_s[...],
                        preferred_element_type=jnp.float32)
    h = jnp.maximum(pre + bl1_ref[...], 0.0)                            # (B, 288) f32
    logits = jnp.dot(h.astype(jnp.bfloat16), wl2_ref[...],
                     preferred_element_type=jnp.float32) + bl2_ref[...]
    m = jnp.max(logits, axis=1, keepdims=True)
    e = jnp.exp(logits - m)
    out_ref[...] = e / jnp.sum(e, axis=1, keepdims=True)                # exact: 1e-5 row sums hold


def init_params(key):
    ks = jax.random.split(key, 12)
    p = {
        "conv1_w": 0.1 * jax.random.normal(ks[0], (C1, 1, 3, 3), jnp.float32),
        "conv1_b": 0.1 * jax.random.normal(ks[1], (C1,), jnp.float32),
        "conv2_w": 0.1 * jax.random.normal(ks[2], (C2, C1, 3, 3), jnp.float32),
        "conv2_b": 0.1 * jax.random.normal(ks[3], (C2,), jnp.float32),
        "bn1_gamma": 1.0 + 0.1 * jax.random.normal(ks[4], (C1,), jnp.float32),
        "bn1_beta": 0.1 * jax.random.normal(ks[5], (C1,), jnp.float32),
        "bn1_mean": 0.1 * jax.random.normal(ks[6], (C1,), jnp.float32),
        "bn1_var": jax.random.uniform(ks[7], (C1,), jnp.float32, 0.5, 1.5),
        "bn2_gamma": 1.0 + 0.1 * jax.random.normal(ks[8], (C2,), jnp.float32),
        "bn2_beta": 0.1 * jax.random.normal(ks[9], (C2,), jnp.float32),
        "bn2_mean": 0.1 * jax.random.normal(ks[10], (C2,), jnp.float32),
        "bn2_var": jax.random.uniform(ks[11], (C2,), jnp.float32, 0.5, 1.5),
    }
    k2 = jax.random.split(jax.random.fold_in(key, 1), 4)
    p["lin1_w"] = 0.05 * jax.random.normal(k2[0], (FLAT + PA_DIM, FLAT), jnp.float32)  # (in, out)
    p["lin1_b"] = 0.05 * jax.random.normal(k2[1], (1, FLAT), jnp.float32)
    p["lin2_w"] = 0.05 * jax.random.normal(k2[2], (FLAT, MAX_MOVES), jnp.float32)      # (in, out)
    p["lin2_b"] = 0.05 * jax.random.normal(k2[3], (1, MAX_MOVES), jnp.float32)
    return p


def fold_params(p):
    """One-time weight prep (outside the forward path):
       - fold eval-mode BN + conv bias,
       - build the two Toeplitz conv matrices T1/T2 (torch CHW flatten order baked in),
       - split lin1's weight at row 288 (kills the concat),
       - convert all MXU weights to bf16."""
    s1 = p["bn1_gamma"] / jnp.sqrt(p["bn1_var"] + EPS)
    b1 = p["bn1_beta"] + s1 * (p["conv1_b"] - p["bn1_mean"])
    s2 = p["bn2_gamma"] / jnp.sqrt(p["bn2_var"] + EPS)
    b2 = p["bn2_beta"] + s2 * (p["conv2_b"] - p["bn2_mean"])

    dn = ("NCHW", "OIHW", "NCHW")
    # T1: response of conv1 (padding=1, no bias) to the 64 one-hot 8x8 inputs, BN1 scale folded.
    eye1 = jnp.eye(H * W, dtype=jnp.float32).reshape(H * W, 1, H, W)
    t1 = lax.conv_general_dilated(eye1, p["conv1_w"], (1, 1), ((1, 1), (1, 1)),
                                  dimension_numbers=dn)                 # (64, 4, 8, 8)
    t1 = (t1 * s1[None, :, None, None]).reshape(H * W, CONV1_OUT)       # (64, 256), cols = CHW
    bc1 = jnp.broadcast_to(b1[:, None, None], (C1, H, W)).reshape(1, CONV1_OUT)

    # T2: response of conv2 (valid, no bias) to the 256 one-hot (4,8,8) inputs, BN2 scale folded.
    eye2 = jnp.eye(CONV1_OUT, dtype=jnp.float32).reshape(CONV1_OUT, C1, H, W)
    t2 = lax.conv_general_dilated(eye2, p["conv2_w"], (1, 1), ((0, 0), (0, 0)),
                                  dimension_numbers=dn)                 # (256, 8, 6, 6)
    t2 = (t2 * s2[None, :, None, None]).reshape(CONV1_OUT, FLAT)        # (256, 288), cols = CHW
    bc2 = jnp.broadcast_to(b2[:, None, None], (C2, 6, 6)).reshape(1, FLAT)

    return {
        "t1": t1.astype(jnp.bfloat16), "bc1": bc1.astype(jnp.float32),
        "t2": t2.astype(jnp.bfloat16), "bc2": bc2.astype(jnp.float32),
        "w1a": p["lin1_w"][:FLAT].astype(jnp.bfloat16),     # conv-feature rows (torch CHW order)
        "w1b": p["lin1_w"][FLAT:].astype(jnp.bfloat16),     # possible_actions rows
        "bl1": p["lin1_b"].astype(jnp.float32),
        "wl2": p["lin2_w"].astype(jnp.bfloat16),
        "bl2": p["lin2_b"].astype(jnp.float32),
    }


def dqn_forward(fp, x, possible_actions):
    # x: (B, 1, 8, 8) NCHW (like the PyTorch module); possible_actions: (B, max_moves*2*64)
    # Note: per-call overhead dominates at B=2 — batching up to ~128-256 states per call adds
    # essentially zero MXU latency (LHS rows are far below the MXU height on every generation).
    n = x.shape[0]
    x2 = x.astype(jnp.float32).reshape(n, H * W)             # conv padding is baked into T1
    pa = possible_actions.astype(jnp.float32)
    return pl.pallas_call(
        _dqn_kernel,
        out_shape=jax.ShapeDtypeStruct((n, MAX_MOVES), jnp.float32),
        in_specs=[_VMEM, _VMEM,                              # x, possible_actions
                  _VMEM, _VMEM, _VMEM, _VMEM,                # T1, bc1, T2, bc2
                  _ANY, _ANY,                                # w1a, w1b (manually DMA'd, overlapped)
                  _VMEM, _VMEM, _VMEM],                      # bl1, wl2, bl2
        out_specs=_VMEM,
        scratch_shapes=[pltpu.VMEM((FLAT, FLAT), jnp.bfloat16),     # w1a landing buffer
                        pltpu.VMEM((PA_DIM, FLAT), jnp.bfloat16),   # w1b landing buffer
                        pltpu.SemaphoreType.DMA((2,))],
    )(x2, pa,
      fp["t1"], fp["bc1"], fp["t2"], fp["bc2"],
      fp["w1a"], fp["w1b"], fp["bl1"], fp["wl2"], fp["bl2"])


def reference_forward(p, x, pa):
    """Pure-JAX reference of the PyTorch forward (eval-mode BN), f32 everywhere."""
    x = x.astype(jnp.float32)
    dn = ("NCHW", "OIHW", "NCHW")

    def bn(y, g, b, m, v):
        return (y - m[None, :, None, None]) * (g / jnp.sqrt(v + EPS))[None, :, None, None] \
            + b[None, :, None, None]

    y = lax.conv_general_dilated(x, p["conv1_w"], (1, 1), ((1, 1), (1, 1)), dimension_numbers=dn)
    y = y + p["conv1_b"][None, :, None, None]
    y = jnp.maximum(bn(y, p["bn1_gamma"], p["bn1_beta"], p["bn1_mean"], p["bn1_var"]), 0.0)
    y = lax.conv_general_dilated(y, p["conv2_w"], (1, 1), ((0, 0), (0, 0)), dimension_numbers=dn)
    y = y + p["conv2_b"][None, :, None, None]
    y = jnp.maximum(bn(y, p["bn2_gamma"], p["bn2_beta"], p["bn2_mean"], p["bn2_var"]), 0.0)
    flat = y.reshape(y.shape[0], -1)
    feat = jnp.concatenate([flat, pa.astype(jnp.float32)], axis=1)
    h = jnp.maximum(feat @ p["lin1_w"] + p["lin1_b"], 0.0)
    logits = h @ p["lin2_w"] + p["lin2_b"]
    return jax.nn.softmax(logits, axis=1)


if __name__ == "__main__":
    key = jax.random.PRNGKey(0)
    kx, ka, kp = jax.random.split(key, 3)
    x = jax.random.normal(kx, (B, 1, H, W), jnp.float32)
    possible_actions = jax.random.bernoulli(ka, 0.5, (B, PA_DIM)).astype(jnp.float32)
    params = init_params(kp)
    folded = fold_params(params)                                   # one-time weight prep

    forward = jax.jit(dqn_forward)
    out = jax.block_until_ready(forward(folded, x, possible_actions))

    assert out.shape == (B, MAX_MOVES)
    assert bool(jnp.all(jnp.isfinite(out)))
    assert bool(jnp.allclose(jnp.sum(out, axis=1), 1.0, atol=1e-5))    # softmax rows sum to 1
    ref = reference_forward(params, x, possible_actions)
    assert bool(jnp.allclose(out, ref, atol=2e-2)), "mismatch vs pure-JAX reference"
    print("KERNEL_OK")
</pallas_src>

<mosaic_0001>
module attributes {stable_mosaic.version = 11 : i64} {
  func.func @_dqn_kernel(%arg0: memref<2x64xf32, #tpu.memory_space<vmem>>, %arg1: memref<2x512xf32, #tpu.memory_space<vmem>>, %arg2: memref<64x256xbf16, #tpu.memory_space<vmem>>, %arg3: memref<1x256xf32, #tpu.memory_space<vmem>>, %arg4: memref<256x288xbf16, #tpu.memory_space<vmem>>, %arg5: memref<1x288xf32, #tpu.memory_space<vmem>>, %arg6: memref<288x288xbf16, #tpu.memory_space<any>>, %arg7: memref<512x288xbf16, #tpu.memory_space<any>>, %arg8: memref<1x288xf32, #tpu.memory_space<vmem>>, %arg9: memref<288x4xbf16, #tpu.memory_space<vmem>>, %arg10: memref<1x4xf32, #tpu.memory_space<vmem>>, %arg11: memref<2x4xf32, #tpu.memory_space<vmem>>, %arg12: memref<288x288xbf16, #tpu.memory_space<vmem>>, %arg13: memref<512x288xbf16, #tpu.memory_space<vmem>>, %arg14: memref<2x!tpu.dma_semaphore, #tpu.memory_space<semaphore_mem>>) attributes {dimension_semantics = [], scalar_prefetch = 0 : i64, scratch_operands = 3 : i64, tpu.core_type = #tpu.core_type<tc>} {
    %c0_i32 = arith.constant 0 : i32
    %0 = tpu.memref_slice %arg14[%c0_i32] : memref<2x!tpu.dma_semaphore, #tpu.memory_space<semaphore_mem>> -> memref<1x!tpu.dma_semaphore, #tpu.memory_space<semaphore_mem>>
    %1 = tpu.memref_squeeze %0 : memref<1x!tpu.dma_semaphore, #tpu.memory_space<semaphore_mem>> -> memref<!tpu.dma_semaphore, #tpu.memory_space<semaphore_mem>>
    tpu.enqueue_dma source(%arg6 : memref<288x288xbf16, #tpu.memory_space<any>>) target(%arg12 : memref<288x288xbf16, #tpu.memory_space<vmem>>) target_semaphore(%1 : memref<!tpu.dma_semaphore, #tpu.memory_space<semaphore_mem>>)
    %c1_i32 = arith.constant 1 : i32
    %2 = tpu.memref_slice %arg14[%c1_i32] : memref<2x!tpu.dma_semaphore, #tpu.memory_space<semaphore_mem>> -> memref<1x!tpu.dma_semaphore, #tpu.memory_space<semaphore_mem>>
    %3 = tpu.memref_squeeze %2 : memref<1x!tpu.dma_semaphore, #tpu.memory_space<semaphore_mem>> -> memref<!tpu.dma_semaphore, #tpu.memory_space<semaphore_mem>>
    tpu.enqueue_dma source(%arg7 : memref<512x288xbf16, #tpu.memory_space<any>>) target(%arg13 : memref<512x288xbf16, #tpu.memory_space<vmem>>) target_semaphore(%3 : memref<!tpu.dma_semaphore, #tpu.memory_space<semaphore_mem>>)
    %c0 = arith.constant 0 : index
    %c0_0 = arith.constant 0 : index
    %4 = vector.load %arg0[%c0, %c0_0] : memref<2x64xf32, #tpu.memory_space<vmem>>, vector<2x64xf32>
    %5 = arith.truncf %4 : vector<2x64xf32> to vector<2x64xbf16>
    %c0_1 = arith.constant 0 : index
    %c0_2 = arith.constant 0 : index
    %6 = vector.load %arg2[%c0_1, %c0_2] : memref<64x256xbf16, #tpu.memory_space<vmem>>, vector<64x256xbf16>
    %cst = arith.constant dense<0.000000e+00> : vector<2x256xf32>
    %7 = tpu.matmul %5, %6, %cst {dimension_numbers = #tpu.dot_dimension_numbers<[1], [0], [0], [1], [0, 0, 1, 1], [], []>} : vector<2x64xbf16>, vector<64x256xbf16>, vector<2x256xf32> -> vector<2x256xf32>
    %c0_3 = arith.constant 0 : index
    %c0_4 = arith.constant 0 : index
    %8 = vector.load %arg3[%c0_3, %c0_4] : memref<1x256xf32, #tpu.memory_space<vmem>>, vector<1x256xf32>
    %9 = vector.broadcast %8 : vector<1x256xf32> to vector<2x256xf32>
    %10 = arith.addf %7, %9 : vector<2x256xf32>
    %cst_5 = arith.constant 0.000000e+00 : f32
    %11 = vector.broadcast %cst_5 : f32 to vector<2x256xf32>
    %12 = arith.maximumf %10, %11 : vector<2x256xf32>
    %13 = arith.truncf %12 : vector<2x256xf32> to vector<2x256xbf16>
    %c0_6 = arith.constant 0 : index
    %c0_7 = arith.constant 0 : index
    %14 = vector.load %arg4[%c0_6, %c0_7] : memref<256x288xbf16, #tpu.memory_space<vmem>>, vector<256x288xbf16>
    %cst_8 = arith.constant dense<0.000000e+00> : vector<2x288xf32>
    %15 = tpu.matmul %13, %14, %cst_8 {dimension_numbers = #tpu.dot_dimension_numbers<[1], [0], [0], [1], [0, 0, 1, 1], [], []>} : vector<2x256xbf16>, vector<256x288xbf16>, vector<2x288xf32> -> vector<2x288xf32>
    %c0_9 = arith.constant 0 : index
    %c0_10 = arith.constant 0 : index
    %16 = vector.load %arg5[%c0_9, %c0_10] : memref<1x288xf32, #tpu.memory_space<vmem>>, vector<1x288xf32>
    %17 = vector.broadcast %16 : vector<1x288xf32> to vector<2x288xf32>
    %18 = arith.addf %15, %17 : vector<2x288xf32>
    %cst_11 = arith.constant 0.000000e+00 : f32
    %19 = vector.broadcast %cst_11 : f32 to vector<2x288xf32>
    %20 = arith.maximumf %18, %19 : vector<2x288xf32>
    %c0_i32_12 = arith.constant 0 : i32
    %21 = tpu.memref_slice %arg14[%c0_i32_12] : memref<2x!tpu.dma_semaphore, #tpu.memory_space<semaphore_mem>> -> memref<1x!tpu.dma_semaphore, #tpu.memory_space<semaphore_mem>>
    %22 = tpu.memref_squeeze %21 : memref<1x!tpu.dma_semaphore, #tpu.memory_space<semaphore_mem>> -> memref<!tpu.dma_semaphore, #tpu.memory_space<semaphore_mem>>
    tpu.wait_dma2 semaphore(%22 : memref<!tpu.dma_semaphore, #tpu.memory_space<semaphore_mem>>) src(%arg6 : memref<288x288xbf16, #tpu.memory_space<any>>) dst(%arg12 : memref<288x288xbf16, #tpu.memory_space<vmem>>)
    %c1_i32_13 = arith.constant 1 : i32
    %23 = tpu.memref_slice %arg14[%c1_i32_13] : memref<2x!tpu.dma_semaphore, #tpu.memory_space<semaphore_mem>> -> memref<1x!tpu.dma_semaphore, #tpu.memory_space<semaphore_mem>>
    %24 = tpu.memref_squeeze %23 : memref<1x!tpu.dma_semaphore, #tpu.memory_space<semaphore_mem>> -> memref<!tpu.dma_semaphore, #tpu.memory_space<semaphore_mem>>
    tpu.wait_dma2 semaphore(%24 : memref<!tpu.dma_semaphore, #tpu.memory_space<semaphore_mem>>) src(%arg7 : memref<512x288xbf16, #tpu.memory_space<any>>) dst(%arg13 : memref<512x288xbf16, #tpu.memory_space<vmem>>)
    %25 = arith.truncf %20 : vector<2x288xf32> to vector<2x288xbf16>
    %c0_14 = arith.constant 0 : index
    %c0_15 = arith.constant 0 : index
    %26 = vector.load %arg12[%c0_14, %c0_15] : memref<288x288xbf16, #tpu.memory_space<vmem>>, vector<288x288xbf16>
    %cst_16 = arith.constant dense<0.000000e+00> : vector<2x288xf32>
    %27 = tpu.matmul %25, %26, %cst_16 {dimension_numbers = #tpu.dot_dimension_numbers<[1], [0], [0], [1], [0, 0, 1, 1], [], []>} : vector<2x288xbf16>, vector<288x288xbf16>, vector<2x288xf32> -> vector<2x288xf32>
    %c0_17 = arith.constant 0 : index
    %c0_18 = arith.constant 0 : index
    %28 = vector.load %arg1[%c0_17, %c0_18] : memref<2x512xf32, #tpu.memory_space<vmem>>, vector<2x512xf32>
    %29 = arith.truncf %28 : vector<2x512xf32> to vector<2x512xbf16>
    %c0_19 = arith.constant 0 : index
    %c0_20 = arith.constant 0 : index
    %30 = vector.load %arg13[%c0_19, %c0_20] : memref<512x288xbf16, #tpu.memory_space<vmem>>, vector<512x288xbf16>
    %cst_21 = arith.constant dense<0.000000e+00> : vector<2x288xf32>
    %31 = tpu.matmul %29, %30, %cst_21 {dimension_numbers = #tpu.dot_dimension_numbers<[1], [0], [0], [1], [0, 0, 1, 1], [], []>} : vector<2x512xbf16>, vector<512x288xbf16>, vector<2x288xf32> -> vector<2x288xf32>
    %32 = arith.addf %27, %31 : vector<2x288xf32>
    %c0_22 = arith.constant 0 : index
    %c0_23 = arith.constant 0 : index
    %33 = vector.load %arg8[%c0_22, %c0_23] : memref<1x288xf32, #tpu.memory_space<vmem>>, vector<1x288xf32>
    %34 = vector.broadcast %33 : vector<1x288xf32> to vector<2x288xf32>
    %35 = arith.addf %32, %34 : vector<2x288xf32>
    %cst_24 = arith.constant 0.000000e+00 : f32
    %36 = vector.broadcast %cst_24 : f32 to vector<2x288xf32>
    %37 = arith.maximumf %35, %36 : vector<2x288xf32>
    %38 = arith.truncf %37 : vector<2x288xf32> to vector<2x288xbf16>
    %c0_25 = arith.constant 0 : index
    %c0_26 = arith.constant 0 : index
    %39 = vector.load %arg9[%c0_25, %c0_26] : memref<288x4xbf16, #tpu.memory_space<vmem>>, vector<288x4xbf16>
    %cst_27 = arith.constant dense<0.000000e+00> : vector<2x4xf32>
    %40 = tpu.matmul %38, %39, %cst_27 {dimension_numbers = #tpu.dot_dimension_numbers<[1], [0], [0], [1], [0, 0, 1, 1], [], []>} : vector<2x288xbf16>, vector<288x4xbf16>, vector<2x4xf32> -> vector<2x4xf32>
    %c0_28 = arith.constant 0 : index
    %c0_29 = arith.constant 0 : index
    %41 = vector.load %arg10[%c0_28, %c0_29] : memref<1x4xf32, #tpu.memory_space<vmem>>, vector<1x4xf32>
    %42 = vector.broadcast %41 : vector<1x4xf32> to vector<2x4xf32>
    %43 = arith.addf %40, %42 : vector<2x4xf32>
    %cst_30 = arith.constant dense<0xFF800000> : vector<2xf32>
    %44 = vector.multi_reduction <maximumf>, %43, %cst_30 [1] : vector<2x4xf32> to vector<2xf32>
    %45 = vector.shape_cast %44 : vector<2xf32> to vector<2x1xf32>
    %46 = vector.broadcast %45 : vector<2x1xf32> to vector<2x4xf32>
    %47 = arith.subf %43, %46 : vector<2x4xf32>
    %48 = math.exp %47 : vector<2x4xf32>
    %cst_31 = arith.constant dense<0.000000e+00> : vector<2xf32>
    %49 = vector.multi_reduction <add>, %48, %cst_31 [1] : vector<2x4xf32> to vector<2xf32>
    %50 = vector.shape_cast %49 : vector<2xf32> to vector<2x1xf32>
    %51 = vector.broadcast %50 : vector<2x1xf32> to vector<2x4xf32>
    %52 = arith.divf %48, %51 : vector<2x4xf32>
    %c0_32 = arith.constant 0 : index
    %c0_33 = arith.constant 0 : index
    %53 = vector.load %arg11[%c0_32, %c0_33] : memref<2x4xf32, #tpu.memory_space<vmem>>, vector<2x4xf32>
    tpu.vector_store %arg11[%c0_32, %c0_33], %52 {strides = array<i32>} : memref<2x4xf32, #tpu.memory_space<vmem>>, vector<2x4xf32>,
    return
  }
}

</mosaic_0001>

<bundles_post_ra>
// kernel: dqn_forward.1
= control target key start
LH: loop header
LB: loop body
LE: loop exit
PB: predicated region body
PF: predicated region fallthrough
CT: control target
= control target key end

     0   :  { %16 = vsyncpa [#allocation6], 0  ;;  %s4142_s0 = inlined_call_operand.vmem [shape: f32[2,64], index: 0, kind: input, shape index: {}]   ;;  %s4143_s1 = inlined_call_operand.vmem [shape: f32[2,512], index: 1, kind: input, shape index: {}]   ;;  %s4144_s2 = inlined_call_operand.vmem [shape: bf16[64,256], index: 2, kind: input, shape index: {}]   ;;  %s4145_s3 = inlined_call_operand.vmem [shape: f32[1,256], index: 3, kind: input, shape index: {}]   ;;  %s4146_s4 = inlined_call_operand.vmem [shape: bf16[256,288], index: 4, kind: input, shape index: {}]   ;;  %s4147_s5 = inlined_call_operand.vmem [shape: f32[1,288], index: 5, kind: input, shape index: {}]   ;;  %s4148_s6 = inlined_call_operand.vmem [shape: bf16[288,288], index: 6, kind: input, shape index: {}]   ;;  %s4149_s7 = inlined_call_operand.vmem [shape: bf16[512,288], index: 7, kind: input, shape index: {}]   ;;  %s4150_s8 = inlined_call_operand.vmem [shape: f32[1,288], index: 8, kind: input, shape index: {}]   ;;  %s4151_s9 = inlined_call_operand.vmem [shape: bf16[288,4], index: 9, kind: input, shape index: {}]   ;;  %s4152_s10 = inlined_call_operand.vmem [shape: f32[1,4], index: 10, kind: input, shape index: {}]   ;;  %s4153_s11 = inlined_call_operand.hbm [shape: f32[2,4], index: 11, kind: output, shape index: {}]  }
   0x1   :  { %v69_v0 = vld [vmem:[%s4148_s6] sm:$0xff]  ;;  %v71_v1 = vld [vmem:[%s4148_s6 + $0x8] sm:$0xff]  ;;  %v73_v2 = vld [vmem:[%s4148_s6 + $0x10] sm:$0xff] }
   0x2   :  { %70 = vst [vmem:[#allocation2] sm:$0xff] %v69_v0  ;;  %72 = vst [vmem:[#allocation2 + $0x8] sm:$0xff] %v71_v1  ;;  %v75_v3 = vld [vmem:[%s4148_s6 + $0x18] sm:$0xff]  ;;  %v77_v4 = vld [vmem:[%s4148_s6 + $0x20] sm:$0xff] }
   0x3   :  { %74 = vst [vmem:[#allocation2 + $0x10] sm:$0xff] %v73_v2  ;;  %76 = vst [vmem:[#allocation2 + $0x18] sm:$0xff] %v75_v3  ;;  %v79_v5 = vld [vmem:[%s4148_s6 + $0x28] sm:$0xff]  ;;  %v81_v6 = vld [vmem:[%s4148_s6 + $0x30] sm:$0xff] }
   0x4   :  { %78 = vst [vmem:[#allocation2 + $0x20] sm:$0xff] %v77_v4  ;;  %v83_v7 = vld [vmem:[%s4148_s6 + $0x38] sm:$0xff]  ;;  %80 = vst [vmem:[#allocation2 + $0x28] sm:$0xff] %v79_v5  ;;  %v85_v8 = vld [vmem:[%s4148_s6 + $0x40] sm:$0xff] }
   0x5   :  { %82 = vst [vmem:[#allocation2 + $0x30] sm:$0xff] %v81_v6  ;;  %84 = vst [vmem:[#allocation2 + $0x38] sm:$0xff] %v83_v7  ;;  %v87_v9 = vld [vmem:[%s4148_s6 + $0x48] sm:$0xff]  ;;  %v89_v10 = vld [vmem:[%s4148_s6 + $0x50] sm:$0xff] }
   0x6   :  { %86 = vst [vmem:[#allocation2 + $0x40] sm:$0xff] %v85_v8  ;;  %88 = vst [vmem:[#allocation2 + $0x48] sm:$0xff] %v87_v9  ;;  %v91_v11 = vld [vmem:[%s4148_s6 + $0x58] sm:$0xff]  ;;  %v93_v12 = vld [vmem:[%s4148_s6 + $0x60] sm:$0xff] }
   0x7   :  { %90 = vst [vmem:[#allocation2 + $0x50] sm:$0xff] %v89_v10  ;;  %v95_v13 = vld [vmem:[%s4148_s6 + $0x68] sm:$0xff]  ;;  %92 = vst [vmem:[#allocation2 + $0x58] sm:$0xff] %v91_v11  ;;  %v97_v14 = vld [vmem:[%s4148_s6 + $0x70] sm:$0xff] }
   0x8   :  { %94 = vst [vmem:[#allocation2 + $0x60] sm:$0xff] %v93_v12  ;;  %96 = vst [vmem:[#allocation2 + $0x68] sm:$0xff] %v95_v13  ;;  %v99_v15 = vld [vmem:[%s4148_s6 + $0x78] sm:$0xff]  ;;  %v101_v16 = vld [vmem:[%s4148_s6 + $0x80] sm:$0xff] }
   0x9   :  { %98 = vst [vmem:[#allocation2 + $0x70] sm:$0xff] %v97_v14  ;;  %100 = vst [vmem:[#allocation2 + $0x78] sm:$0xff] %v99_v15  ;;  %v103_v17 = vld [vmem:[%s4148_s6 + $0x88] sm:$0xff]  ;;  %v105_v18 = vld [vmem:[%s4148_s6 + $0x90] sm:$0xff] }
   0xa   :  { %102 = vst [vmem:[#allocation2 + $0x80] sm:$0xff] %v101_v16  ;;  %v107_v19 = vld [vmem:[%s4148_s6 + $0x98] sm:$0xff]  ;;  %104 = vst [vmem:[#allocation2 + $0x88] sm:$0xff] %v103_v17  ;;  %v109_v20 = vld [vmem:[%s4148_s6 + $0xa0] sm:$0xff] }
   0xb   :  { %106 = vst [vmem:[#allocation2 + $0x90] sm:$0xff] %v105_v18  ;;  %108 = vst [vmem:[#allocation2 + $0x98] sm:$0xff] %v107_v19  ;;  %v111_v21 = vld [vmem:[%s4148_s6 + $0xa8] sm:$0xff]  ;;  %v113_v22 = vld [vmem:[%s4148_s6 + $0xb0] sm:$0xff] }
   0xc   :  { %110 = vst [vmem:[#allocation2 + $0xa0] sm:$0xff] %v109_v20  ;;  %112 = vst [vmem:[#allocation2 + $0xa8] sm:$0xff] %v111_v21  ;;  %v115_v23 = vld [vmem:[%s4148_s6 + $0xb8] sm:$0xff]  ;;  %v117_v24 = vld [vmem:[%s4148_s6 + $0xc0] sm:$0xff] }
   0xd   :  { %114 = vst [vmem:[#allocation2 + $0xb0] sm:$0xff] %v113_v22  ;;  %v119_v25 = vld [vmem:[%s4148_s6 + $0xc8] sm:$0xff]  ;;  %116 = vst [vmem:[#allocation2 + $0xb8] sm:$0xff] %v115_v23  ;;  %v121_v26 = vld [vmem:[%s4148_s6 + $0xd0] sm:$0xff] }
   0xe   :  { %118 = vst [vmem:[#allocation2 + $0xc0] sm:$0xff] %v117_v24  ;;  %120 = vst [vmem:[#allocation2 + $0xc8] sm:$0xff] %v119_v25  ;;  %v123_v27 = vld [vmem:[%s4148_s6 + $0xd8] sm:$0xff]  ;;  %v125_v28 = vld [vmem:[%s4148_s6 + $0xe0] sm:$0xff] }
   0xf   :  { %122 = vst [vmem:[#allocation2 + $0xd0] sm:$0xff] %v121_v26  ;;  %124 = vst [vmem:[#allocation2 + $0xd8] sm:$0xff] %v123_v27  ;;  %v127_v29 = vld [vmem:[%s4148_s6 + $0xe8] sm:$0xff]  ;;  %v129_v30 = vld [vmem:[%s4148_s6 + $0xf0] sm:$0xff] }
  0x10   :  { %126 = vst [vmem:[#allocation2 + $0xe0] sm:$0xff] %v125_v28  ;;  %v131_v31 = vld [vmem:[%s4148_s6 + $0xf8] sm:$0xff]  ;;  %128 = vst [vmem:[#allocation2 + $0xe8] sm:$0xff] %v127_v29  ;;  %v133_v32 = vld [vmem:[%s4148_s6 + $0x100] sm:$0xff] }
  0x11   :  { %130 = vst [vmem:[#allocation2 + $0xf0] sm:$0xff] %v129_v30  ;;  %132 = vst [vmem:[#allocation2 + $0xf8] sm:$0xff] %v131_v31  ;;  %v135_v33 = vld [vmem:[%s4148_s6 + $0x108] sm:$0xff]  ;;  %v137_v34 = vld [vmem:[%s4148_s6 + $0x110] sm:$0xff] }
  0x12   :  { %134 = vst [vmem:[#allocation2 + $0x100] sm:$0xff] %v133_v32  ;;  %136 = vst [vmem:[#allocation2 + $0x108] sm:$0xff] %v135_v33  ;;  %v139_v35 = vld [vmem:[%s4148_s6 + $0x118] sm:$0xff]  ;;  %v141_v36 = vld [vmem:[%s4148_s6 + $0x120] sm:$0xff] }
  0x13   :  { %138 = vst [vmem:[#allocation2 + $0x110] sm:$0xff] %v137_v34  ;;  %v143_v37 = vld [vmem:[%s4148_s6 + $0x128] sm:$0xff]  ;;  %140 = vst [vmem:[#allocation2 + $0x118] sm:$0xff] %v139_v35  ;;  %v145_v38 = vld [vmem:[%s4148_s6 + $0x130] sm:$0xff] }
  0x14   :  { %142 = vst [vmem:[#allocation2 + $0x120] sm:$0xff] %v141_v36  ;;  %144 = vst [vmem:[#allocation2 + $0x128] sm:$0xff] %v143_v37  ;;  %v147_v39 = vld [vmem:[%s4148_s6 + $0x138] sm:$0xff]  ;;  %v149_v40 = vld [vmem:[%s4148_s6 + $0x140] sm:$0xff] }
  0x15   :  { %146 = vst [vmem:[#allocation2 + $0x130] sm:$0xff] %v145_v38  ;;  %148 = vst [vmem:[#allocation2 + $0x138] sm:$0xff] %v147_v39  ;;  %v151_v41 = vld [vmem:[%s4148_s6 + $0x148] sm:$0xff]  ;;  %v153_v42 = vld [vmem:[%s4148_s6 + $0x150] sm:$0xff] }
  0x16   :  { %150 = vst [vmem:[#allocation2 + $0x140] sm:$0xff] %v149_v40  ;;  %v155_v43 = vld [vmem:[%s4148_s6 + $0x158] sm:$0xff]  ;;  %152 = vst [vmem:[#allocation2 + $0x148] sm:$0xff] %v151_v41  ;;  %v157_v44 = vld [vmem:[%s4148_s6 + $0x160] sm:$0xff] }
  0x17   :  { %154 = vst [vmem:[#allocation2 + $0x150] sm:$0xff] %v153_v42  ;;  %156 = vst [vmem:[#allocation2 + $0x158] sm:$0xff] %v155_v43  ;;  %v159_v45 = vld [vmem:[%s4148_s6 + $0x168] sm:$0xff]  ;;  %v161_v46 = vld [vmem:[%s4148_s6 + $0x170] sm:$0xff] }
  0x18   :  { %158 = vst [vmem:[#allocation2 + $0x160] sm:$0xff] %v157_v44  ;;  %160 = vst [vmem:[#allocation2 + $0x168] sm:$0xff] %v159_v45  ;;  %v163_v47 = vld [vmem:[%s4148_s6 + $0x178] sm:$0xff]  ;;  %v165_v48 = vld [vmem:[%s4148_s6 + $0x180] sm:$0xff] }
  0x19   :  { %162 = vst [vmem:[#allocation2 + $0x170] sm:$0xff] %v161_v46  ;;  %v167_v49 = vld [vmem:[%s4148_s6 + $0x188] sm:$0xff]  ;;  %164 = vst [vmem:[#allocation2 + $0x178] sm:$0xff] %v163_v47  ;;  %v169_v50 = vld [vmem:[%s4148_s6 + $0x190] sm:$0xff] }
  0x1a   :  { %166 = vst [vmem:[#allocation2 + $0x180] sm:$0xff] %v165_v48  ;;  %168 = vst [vmem:[#allocation2 + $0x188] sm:$0xff] %v167_v49  ;;  %v171_v51 = vld [vmem:[%s4148_s6 + $0x198] sm:$0xff]  ;;  %v173_v52 = vld [vmem:[%s4148_s6 + $0x1a0] sm:$0xff] }
  0x1b   :  { %170 = vst [vmem:[#allocation2 + $0x190] sm:$0xff] %v169_v50  ;;  %172 = vst [vmem:[#allocation2 + $0x198] sm:$0xff] %v171_v51  ;;  %v175_v53 = vld [vmem:[%s4148_s6 + $0x1a8] sm:$0xff] }
  0x1c   :  { %174 = vst [vmem:[#allocation2 + $0x1a0] sm:$0xff] %v173_v52  ;;  %176 = vst [vmem:[#allocation2 + $0x1a8] sm:$0xff] %v175_v53 }
  0x1d   :  { %184 = vsyncadd [#allocation4], 6912  ;;  %v219_v54 = vld [vmem:[%s4149_s7] sm:$0xff]  ;;  %v221_v55 = vld [vmem:[%s4149_s7 + $0x8] sm:$0xff] }
  0x1e   :  { %220 = vst [vmem:[#allocation3] sm:$0xff] %v219_v54  ;;  %222 = vst [vmem:[#allocation3 + $0x8] sm:$0xff] %v221_v55  ;;  %v223_v56 = vld [vmem:[%s4149_s7 + $0x10] sm:$0xff]  ;;  %v225_v57 = vld [vmem:[%s4149_s7 + $0x18] sm:$0xff] }
  0x1f   :  { %v227_v58 = vld [vmem:[%s4149_s7 + $0x20] sm:$0xff]  ;;  %224 = vst [vmem:[#allocation3 + $0x10] sm:$0xff] %v223_v56  ;;  %226 = vst [vmem:[#allocation3 + $0x18] sm:$0xff] %v225_v57  ;;  %v229_v59 = vld [vmem:[%s4149_s7 + $0x28] sm:$0xff] }
  0x20   :  { %228 = vst [vmem:[#allocation3 + $0x20] sm:$0xff] %v227_v58  ;;  %v231_v60 = vld [vmem:[%s4149_s7 + $0x30] sm:$0xff]  ;;  %v233_v61 = vld [vmem:[%s4149_s7 + $0x38] sm:$0xff]  ;;  %230 = vst [vmem:[#allocation3 + $0x28] sm:$0xff] %v229_v59 }
  0x21   :  { %232 = vst [vmem:[#allocation3 + $0x30] sm:$0xff] %v231_v60  ;;  %234 = vst [vmem:[#allocation3 + $0x38] sm:$0xff] %v233_v61  ;;  %v235_v62 = vld [vmem:[%s4149_s7 + $0x40] sm:$0xff]  ;;  %v237_v63 = vld [vmem:[%s4149_s7 + $0x48] sm:$0xff] }
  0x22   :  { %v239_v0 = vld [vmem:[%s4149_s7 + $0x50] sm:$0xff]  ;;  %236 = vst [vmem:[#allocation3 + $0x40] sm:$0xff] %v235_v62  ;;  %238 = vst [vmem:[#allocation3 + $0x48] sm:$0xff] %v237_v63  ;;  %v241_v1 = vld [vmem:[%s4149_s7 + $0x58] sm:$0xff] }
  0x23   :  { %240 = vst [vmem:[#allocation3 + $0x50] sm:$0xff] %v239_v0  ;;  %v243_v2 = vld [vmem:[%s4149_s7 + $0x60] sm:$0xff]  ;;  %v245_v3 = vld [vmem:[%s4149_s7 + $0x68] sm:$0xff]  ;;  %242 = vst [vmem:[#allocation3 + $0x58] sm:$0xff] %v241_v1 }
  0x24   :  { %244 = vst [vmem:[#allocation3 + $0x60] sm:$0xff] %v243_v2  ;;  %246 = vst [vmem:[#allocation3 + $0x68] sm:$0xff] %v245_v3  ;;  %v247_v4 = vld [vmem:[%s4149_s7 + $0x70] sm:$0xff]  ;;  %v249_v5 = vld [vmem:[%s4149_s7 + $0x78] sm:$0xff] }
  0x25   :  { %v251_v6 = vld [vmem:[%s4149_s7 + $0x80] sm:$0xff]  ;;  %248 = vst [vmem:[#allocation3 + $0x70] sm:$0xff] %v247_v4  ;;  %250 = vst [vmem:[#allocation3 + $0x78] sm:$0xff] %v249_v5  ;;  %v253_v7 = vld [vmem:[%s4149_s7 + $0x88] sm:$0xff] }
  0x26   :  { %252 = vst [vmem:[#allocation3 + $0x80] sm:$0xff] %v251_v6  ;;  %v255_v8 = vld [vmem:[%s4149_s7 + $0x90] sm:$0xff]  ;;  %v257_v9 = vld [vmem:[%s4149_s7 + $0x98] sm:$0xff]  ;;  %254 = vst [vmem:[#allocation3 + $0x88] sm:$0xff] %v253_v7 }
  0x27   :  { %256 = vst [vmem:[#allocation3 + $0x90] sm:$0xff] %v255_v8  ;;  %258 = vst [vmem:[#allocation3 + $0x98] sm:$0xff] %v257_v9  ;;  %v259_v10 = vld [vmem:[%s4149_s7 + $0xa0] sm:$0xff]  ;;  %v261_v11 = vld [vmem:[%s4149_s7 + $0xa8] sm:$0xff] }
  0x28   :  { %v263_v12 = vld [vmem:[%s4149_s7 + $0xb0] sm:$0xff]  ;;  %260 = vst [vmem:[#allocation3 + $0xa0] sm:$0xff] %v259_v10  ;;  %262 = vst [vmem:[#allocation3 + $0xa8] sm:$0xff] %v261_v11  ;;  %v265_v13 = vld [vmem:[%s4149_s7 + $0xb8] sm:$0xff] }
  0x29   :  { %264 = vst [vmem:[#allocation3 + $0xb0] sm:$0xff] %v263_v12  ;;  %v267_v14 = vld [vmem:[%s4149_s7 + $0xc0] sm:$0xff]  ;;  %v269_v15 = vld [vmem:[%s4149_s7 + $0xc8] sm:$0xff]  ;;  %266 = vst [vmem:[#allocation3 + $0xb8] sm:$0xff] %v265_v13 }
  0x2a   :  { %268 = vst [vmem:[#allocation3 + $0xc0] sm:$0xff] %v267_v14  ;;  %270 = vst [vmem:[#allocation3 + $0xc8] sm:$0xff] %v269_v15  ;;  %v271_v16 = vld [vmem:[%s4149_s7 + $0xd0] sm:$0xff]  ;;  %v273_v17 = vld [vmem:[%s4149_s7 + $0xd8] sm:$0xff] }
  0x2b   :  { %v275_v18 = vld [vmem:[%s4149_s7 + $0xe0] sm:$0xff]  ;;  %272 = vst [vmem:[#allocation3 + $0xd0] sm:$0xff] %v271_v16  ;;  %274 = vst [vmem:[#allocation3 + $0xd8] sm:$0xff] %v273_v17  ;;  %v277_v19 = vld [vmem:[%s4149_s7 + $0xe8] sm:$0xff] }
  0x2c   :  { %276 = vst [vmem:[#allocation3 + $0xe0] sm:$0xff] %v275_v18  ;;  %v279_v20 = vld [vmem:[%s4149_s7 + $0xf0] sm:$0xff]  ;;  %v281_v21 = vld [vmem:[%s4149_s7 + $0xf8] sm:$0xff]  ;;  %278 = vst [vmem:[#allocation3 + $0xe8] sm:$0xff] %v277_v19 }
  0x2d   :  { %280 = vst [vmem:[#allocation3 + $0xf0] sm:$0xff] %v279_v20  ;;  %282 = vst [vmem:[#allocation3 + $0xf8] sm:$0xff] %v281_v21  ;;  %v283_v22 = vld [vmem:[%s4149_s7 + $0x100] sm:$0xff]  ;;  %v285_v23 = vld [vmem:[%s4149_s7 + $0x108] sm:$0xff] }
  0x2e   :  { %v287_v24 = vld [vmem:[%s4149_s7 + $0x110] sm:$0xff]  ;;  %284 = vst [vmem:[#allocation3 + $0x100] sm:$0xff] %v283_v22  ;;  %286 = vst [vmem:[#allocation3 + $0x108] sm:$0xff] %v285_v23  ;;  %v289_v25 = vld [vmem:[%s4149_s7 + $0x118] sm:$0xff] }
  0x2f   :  { %288 = vst [vmem:[#allocation3 + $0x110] sm:$0xff] %v287_v24  ;;  %v291_v26 = vld [vmem:[%s4149_s7 + $0x120] sm:$0xff]  ;;  %v293_v27 = vld [vmem:[%s4149_s7 + $0x128] sm:$0xff]  ;;  %290 = vst [vmem:[#allocation3 + $0x118] sm:$0xff] %v289_v25 }
  0x30   :  { %292 = vst [vmem:[#allocation3 + $0x120] sm:$0xff] %v291_v26  ;;  %294 = vst [vmem:[#allocation3 + $0x128] sm:$0xff] %v293_v27  ;;  %v295_v28 = vld [vmem:[%s4149_s7 + $0x130] sm:$0xff]  ;;  %v297_v29 = vld [vmem:[%s4149_s7 + $0x138] sm:$0xff] }
  0x31   :  { %v299_v30 = vld [vmem:[%s4149_s7 + $0x140] sm:$0xff]  ;;  %296 = vst [vmem:[#allocation3 + $0x130] sm:$0xff] %v295_v28  ;;  %298 = vst [vmem:[#allocation3 + $0x138] sm:$0xff] %v297_v29  ;;  %v301_v31 = vld [vmem:[%s4149_s7 + $0x148] sm:$0xff] }
  0x32   :  { %300 = vst [vmem:[#allocation3 + $0x140] sm:$0xff] %v299_v30  ;;  %v303_v32 = vld [vmem:[%s4149_s7 + $0x150] sm:$0xff]  ;;  %v305_v33 = vld [vmem:[%s4149_s7 + $0x158] sm:$0xff]  ;;  %302 = vst [vmem:[#allocation3 + $0x148] sm:$0xff] %v301_v31 }
  0x33   :  { %304 = vst [vmem:[#allocation3 + $0x150] sm:$0xff] %v303_v32  ;;  %306 = vst [vmem:[#allocation3 + $0x158] sm:$0xff] %v305_v33  ;;  %v307_v34 = vld [vmem:[%s4149_s7 + $0x160] sm:$0xff]  ;;  %v309_v35 = vld [vmem:[%s4149_s7 + $0x168] sm:$0xff] }
  0x34   :  { %v311_v36 = vld [vmem:[%s4149_s7 + $0x170] sm:$0xff]  ;;  %308 = vst [vmem:[#allocation3 + $0x160] sm:$0xff] %v307_v34  ;;  %310 = vst [vmem:[#allocation3 + $0x168] sm:$0xff] %v309_v35  ;;  %v313_v37 = vld [vmem:[%s4149_s7 + $0x178] sm:$0xff] }
  0x35   :  { %312 = vst [vmem:[#allocation3 + $0x170] sm:$0xff] %v311_v36  ;;  %v315_v38 = vld [vmem:[%s4149_s7 + $0x180] sm:$0xff]  ;;  %v317_v39 = vld [vmem:[%s4149_s7 + $0x188] sm:$0xff]  ;;  %314 = vst [vmem:[#allocation3 + $0x178] sm:$0xff] %v313_v37 }
  0x36   :  { %316 = vst [vmem:[#allocation3 + $0x180] sm:$0xff] %v315_v38  ;;  %318 = vst [vmem:[#allocation3 + $0x188] sm:$0xff] %v317_v39  ;;  %v319_v40 = vld [vmem:[%s4149_s7 + $0x190] sm:$0xff]  ;;  %v321_v41 = vld [vmem:[%s4149_s7 + $0x198] sm:$0xff] }
  0x37   :  { %v323_v42 = vld [vmem:[%s4149_s7 + $0x1a0] sm:$0xff]  ;;  %320 = vst [vmem:[#allocation3 + $0x190] sm:$0xff] %v319_v40  ;;  %322 = vst [vmem:[#allocation3 + $0x198] sm:$0xff] %v321_v41  ;;  %v325_v43 = vld [vmem:[%s4149_s7 + $0x1a8] sm:$0xff] }
  0x38   :  { %324 = vst [vmem:[#allocation3 + $0x1a0] sm:$0xff] %v323_v42  ;;  %v327_v44 = vld [vmem:[%s4149_s7 + $0x1b0] sm:$0xff]  ;;  %v329_v45 = vld [vmem:[%s4149_s7 + $0x1b8] sm:$0xff]  ;;  %326 = vst [vmem:[#allocation3 + $0x1a8] sm:$0xff] %v325_v43 }
  0x39   :  { %328 = vst [vmem:[#allocation3 + $0x1b0] sm:$0xff] %v327_v44  ;;  %330 = vst [vmem:[#allocation3 + $0x1b8] sm:$0xff] %v329_v45  ;;  %v331_v46 = vld [vmem:[%s4149_s7 + $0x1c0] sm:$0xff]  ;;  %v333_v47 = vld [vmem:[%s4149_s7 + $0x1c8] sm:$0xff] }
  0x3a   :  { %v335_v48 = vld [vmem:[%s4149_s7 + $0x1d0] sm:$0xff]  ;;  %332 = vst [vmem:[#allocation3 + $0x1c0] sm:$0xff] %v331_v46  ;;  %334 = vst [vmem:[#allocation3 + $0x1c8] sm:$0xff] %v333_v47  ;;  %v337_v49 = vld [vmem:[%s4149_s7 + $0x1d8] sm:$0xff] }
  0x3b   :  { %336 = vst [vmem:[#allocation3 + $0x1d0] sm:$0xff] %v335_v48  ;;  %v339_v50 = vld [vmem:[%s4149_s7 + $0x1e0] sm:$0xff]  ;;  %v341_v51 = vld [vmem:[%s4149_s7 + $0x1e8] sm:$0xff]  ;;  %338 = vst [vmem:[#allocation3 + $0x1d8] sm:$0xff] %v337_v49 }
  0x3c   :  { %340 = vst [vmem:[#allocation3 + $0x1e0] sm:$0xff] %v339_v50  ;;  %342 = vst [vmem:[#allocation3 + $0x1e8] sm:$0xff] %v341_v51  ;;  %v343_v52 = vld [vmem:[%s4149_s7 + $0x1f0] sm:$0xff]  ;;  %v345_v53 = vld [vmem:[%s4149_s7 + $0x1f8] sm:$0xff] }
  0x3d   :  { %v347_v54 = vld [vmem:[%s4149_s7 + $0x200] sm:$0xff]  ;;  %344 = vst [vmem:[#allocation3 + $0x1f0] sm:$0xff] %v343_v52  ;;  %346 = vst [vmem:[#allocation3 + $0x1f8] sm:$0xff] %v345_v53  ;;  %v349_v55 = vld [vmem:[%s4149_s7 + $0x208] sm:$0xff] }
  0x3e   :  { %348 = vst [vmem:[#allocation3 + $0x200] sm:$0xff] %v347_v54  ;;  %v351_v56 = vld [vmem:[%s4149_s7 + $0x210] sm:$0xff]  ;;  %v353_v57 = vld [vmem:[%s4149_s7 + $0x218] sm:$0xff]  ;;  %350 = vst [vmem:[#allocation3 + $0x208] sm:$0xff] %v349_v55 }
  0x3f   :  { %352 = vst [vmem:[#allocation3 + $0x210] sm:$0xff] %v351_v56  ;;  %354 = vst [vmem:[#allocation3 + $0x218] sm:$0xff] %v353_v57  ;;  %v355_v58 = vld [vmem:[%s4149_s7 + $0x220] sm:$0xff]  ;;  %v357_v59 = vld [vmem:[%s4149_s7 + $0x228] sm:$0xff] }
  0x40   :  { %v359_v60 = vld [vmem:[%s4149_s7 + $0x230] sm:$0xff]  ;;  %356 = vst [vmem:[#allocation3 + $0x220] sm:$0xff] %v355_v58  ;;  %358 = vst [vmem:[#allocation3 + $0x228] sm:$0xff] %v357_v59  ;;  %v361_v61 = vld [vmem:[%s4149_s7 + $0x238] sm:$0xff] }
  0x41   :  { %360 = vst [vmem:[#allocation3 + $0x230] sm:$0xff] %v359_v60  ;;  %v363_v62 = vld [vmem:[%s4149_s7 + $0x240] sm:$0xff]  ;;  %v365_v63 = vld [vmem:[%s4149_s7 + $0x248] sm:$0xff]  ;;  %362 = vst [vmem:[#allocation3 + $0x238] sm:$0xff] %v361_v61 }
  0x42   :  { %364 = vst [vmem:[#allocation3 + $0x240] sm:$0xff] %v363_v62  ;;  %366 = vst [vmem:[#allocation3 + $0x248] sm:$0xff] %v365_v63  ;;  %v367_v0 = vld [vmem:[%s4149_s7 + $0x250] sm:$0xff]  ;;  %v369_v1 = vld [vmem:[%s4149_s7 + $0x258] sm:$0xff] }
  0x43   :  { %v371_v2 = vld [vmem:[%s4149_s7 + $0x260] sm:$0xff]  ;;  %368 = vst [vmem:[#allocation3 + $0x250] sm:$0xff] %v367_v0  ;;  %370 = vst [vmem:[#allocation3 + $0x258] sm:$0xff] %v369_v1  ;;  %v373_v3 = vld [vmem:[%s4149_s7 + $0x268] sm:$0xff] }
  0x44   :  { %372 = vst [vmem:[#allocation3 + $0x260] sm:$0xff] %v371_v2  ;;  %v375_v4 = vld [vmem:[%s4149_s7 + $0x270] sm:$0xff]  ;;  %v377_v5 = vld [vmem:[%s4149_s7 + $0x278] sm:$0xff]  ;;  %374 = vst [vmem:[#allocation3 + $0x268] sm:$0xff] %v373_v3 }
  0x45   :  { %376 = vst [vmem:[#allocation3 + $0x270] sm:$0xff] %v375_v4  ;;  %378 = vst [vmem:[#allocation3 + $0x278] sm:$0xff] %v377_v5  ;;  %v379_v6 = vld [vmem:[%s4149_s7 + $0x280] sm:$0xff]  ;;  %v381_v7 = vld [vmem:[%s4149_s7 + $0x288] sm:$0xff] }
  0x46   :  { %v383_v8 = vld [vmem:[%s4149_s7 + $0x290] sm:$0xff]  ;;  %380 = vst [vmem:[#allocation3 + $0x280] sm:$0xff] %v379_v6  ;;  %382 = vst [vmem:[#allocation3 + $0x288] sm:$0xff] %v381_v7  ;;  %v385_v9 = vld [vmem:[%s4149_s7 + $0x298] sm:$0xff] }
  0x47   :  { %384 = vst [vmem:[#allocation3 + $0x290] sm:$0xff] %v383_v8  ;;  %v387_v10 = vld [vmem:[%s4149_s7 + $0x2a0] sm:$0xff]  ;;  %v389_v11 = vld [vmem:[%s4149_s7 + $0x2a8] sm:$0xff]  ;;  %386 = vst [vmem:[#allocation3 + $0x298] sm:$0xff] %v385_v9 }
  0x48   :  { %388 = vst [vmem:[#allocation3 + $0x2a0] sm:$0xff] %v387_v10  ;;  %390 = vst [vmem:[#allocation3 + $0x2a8] sm:$0xff] %v389_v11  ;;  %v391_v12 = vld [vmem:[%s4149_s7 + $0x2b0] sm:$0xff]  ;;  %v393_v13 = vld [vmem:[%s4149_s7 + $0x2b8] sm:$0xff] }
  0x49   :  { %v395_v14 = vld [vmem:[%s4149_s7 + $0x2c0] sm:$0xff]  ;;  %392 = vst [vmem:[#allocation3 + $0x2b0] sm:$0xff] %v391_v12  ;;  %394 = vst [vmem:[#allocation3 + $0x2b8] sm:$0xff] %v393_v13  ;;  %v397_v15 = vld [vmem:[%s4149_s7 + $0x2c8] sm:$0xff] }
  0x4a   :  { %396 = vst [vmem:[#allocation3 + $0x2c0] sm:$0xff] %v395_v14  ;;  %v399_v16 = vld [vmem:[%s4149_s7 + $0x2d0] sm:$0xff]  ;;  %v401_v17 = vld [vmem:[%s4149_s7 + $0x2d8] sm:$0xff]  ;;  %398 = vst [vmem:[#allocation3 + $0x2c8] sm:$0xff] %v397_v15 }
  0x4b   :  { %400 = vst [vmem:[#allocation3 + $0x2d0] sm:$0xff] %v399_v16  ;;  %402 = vst [vmem:[#allocation3 + $0x2d8] sm:$0xff] %v401_v17  ;;  %v403_v18 = vld [vmem:[%s4149_s7 + $0x2e0] sm:$0xff]  ;;  %v405_v19 = vld [vmem:[%s4149_s7 + $0x2e8] sm:$0xff] }
  0x4c   :  { %v407_v20 = vld [vmem:[%s4149_s7 + $0x2f0] sm:$0xff]  ;;  %404 = vst [vmem:[#allocation3 + $0x2e0] sm:$0xff] %v403_v18  ;;  %406 = vst [vmem:[#allocation3 + $0x2e8] sm:$0xff] %v405_v19  ;;  %v409_v21 = vld [vmem:[%s4149_s7 + $0x2f8] sm:$0xff] }
  0x4d   :  { %408 = vst [vmem:[#allocation3 + $0x2f0] sm:$0xff] %v407_v20  ;;  %410 = vst [vmem:[#allocation3 + $0x2f8] sm:$0xff] %v409_v21 }
  0x4e   :  { %418 = vsyncadd [#allocation4 + $0x1], 12288  ;;  %v3001_v22 = vld [vmem:[%s4144_s2 + $0x34] ss:$8 sps:$4 sm:$0xff]   ;;  %v3003_v23 = vld [vmem:[%s4144_s2 + $0x30] ss:$8 sps:$4 sm:$0xff]   ;;  %v431_v17 = vlaneseq }
  0x4f   :  { %v3326_v24 = vmov 0   ;;  %v3004_v25 = vld [vmem:[%s4144_s2 + $0x24] ss:$8 sps:$4 sm:$0xff]   ;;  %493 = vmatprep.subr.bf16.mxu1 %v3001_v22  ;;  %v3006_v26 = vld [vmem:[%s4144_s2 + $0x20] ss:$8 sps:$4 sm:$0xff]   ;;  %vm481_vm0 = vcmask 523264  }
  0x50   :  { %517 = vmatprep.mubr.bf16.mxu1 %v3326_v24  ;;  %494 = vmatpush1.bf16.msra.mxu1 %v3003_v23  ;;  %v3007_v27 = vld [vmem:[%s4144_s2 + $0x14] ss:$8 sps:$4 sm:$0xff]   ;;  %v3009_v28 = vld [vmem:[%s4144_s2 + $0x10] ss:$8 sps:$4 sm:$0xff]   ;;  %v3010_v29 = vld [vmem:[%s4144_s2 + $0x4] ss:$8 sps:$4 sm:$0xff]  }
  0x51   :  { %495 = vmatprep.subr.bf16.mxu1 %v3004_v25  ;;  %v3012_v30 = vld [vmem:[%s4144_s2] ss:$8 sps:$4 sm:$0xff]   ;;  %v3015_v32 = vld [vmem:[%s4146_s4 + $0xac] ss:$12 sps:$4 sm:$0xff]   ;;  %v3040_v36 = vld [vmem:[%s4146_s4 + $0x170] ss:$12 sps:$4 sm:$0xff]  }
  0x52   :  { %v419_v31 = vld [vmem:[%s4142_s0] sm:$0x3]  ;;  %v3013_v34 = vld [vmem:[%s4146_s4 + $0xa8] ss:$12 sps:$4 sm:$0xff]   ;;  %v3041_v37 = vld [vmem:[%s4146_s4 + $0xb0] ss:$12 sps:$4 sm:$0xff]   ;;  %2864 = vmatprep.subr.bf16.mxu0 %v3040_v36 }
  0x53   :  { %v420_v33 = vpack.c.bf16 %v419_v31, %v419_v31  ;;  %v3018_v35 = vld [vmem:[%s4146_s4 + $0x94] ss:$12 sps:$4 sm:$0xff]   ;;  %v3016_v38 = vld [vmem:[%s4146_s4 + $0x90] ss:$12 sps:$4 sm:$0xff]   ;;  %2865 = vmatpush3.bf16.msra.mxu0 %v3041_v37  ;;  %v3045_v40 = vld [vmem:[%s4146_s4 + $0x158] ss:$12 sps:$4 sm:$0xff]  }
  0x54   :  { %496 = vmatpush1.bf16.msra.mxu1 %v3006_v26  ;;  %v3021_v39 = vld [vmem:[%s4146_s4 + $0x7c] ss:$12 sps:$4 sm:$0xff]   ;;  %v3046_v41 = vld [vmem:[%s4146_s4 + $0x98] ss:$12 sps:$4 sm:$0xff]   ;;  %2866 = vmatprep.subr.bf16.mxu0 %v3045_v40  ;;  %v3050_v44 = vld [vmem:[%s4146_s4 + $0x140] ss:$12 sps:$4 sm:$0xff]  }
  0x55   :  { %497 = vmatprep.subr.bf16.mxu1 %v3007_v27  ;;  %v3019_v42 = vld [vmem:[%s4146_s4 + $0x78] ss:$12 sps:$4 sm:$0xff]   ;;  %v3051_v45 = vld [vmem:[%s4146_s4 + $0x80] ss:$12 sps:$4 sm:$0xff]   ;;  %v3055_v48 = vld [vmem:[%s4146_s4 + $0x128] ss:$12 sps:$4 sm:$0xff]  }
  0x56   :  { %v3024_v43 = vld [vmem:[%s4146_s4 + $0x64] ss:$12 sps:$4 sm:$0xff]   ;;  %v3022_v46 = vld [vmem:[%s4146_s4 + $0x60] ss:$12 sps:$4 sm:$0xff]   ;;  %v3056_v49 = vld [vmem:[%s4146_s4 + $0x68] ss:$12 sps:$4 sm:$0xff]  }
  0x57   :  { %2867 = vmatpush3.bf16.msra.mxu0 %v3046_v41  ;;  %v3027_v47 = vld [vmem:[%s4146_s4 + $0x4c] ss:$12 sps:$4 sm:$0xff]   ;;  %v3025_v50 = vld [vmem:[%s4146_s4 + $0x48] ss:$12 sps:$4 sm:$0xff]   ;;  %v3060_v52 = vld [vmem:[%s4146_s4 + $0x110] ss:$12 sps:$4 sm:$0xff]  }
  0x58   :  { %498 = vmatpush1.bf16.msra.mxu1 %v3009_v28  ;;  %2868 = vmatprep.subr.bf16.mxu0 %v3050_v44  ;;  %v3030_v51 = vld [vmem:[%s4146_s4 + $0x34] ss:$12 sps:$4 sm:$0xff]   ;;  %v3061_v53 = vld [vmem:[%s4146_s4 + $0x50] ss:$12 sps:$4 sm:$0xff]   ;;  %v3065_v55 = vld [vmem:[%s4146_s4 + $0xf8] ss:$12 sps:$4 sm:$0xff]  }
  0x59   :  { %499 = vmatprep.subr.bf16.mxu1 %v3010_v29  ;;  %v3028_v54 = vld [vmem:[%s4146_s4 + $0x30] ss:$12 sps:$4 sm:$0xff]   ;;  %v3066_v57 = vld [vmem:[%s4146_s4 + $0x38] ss:$12 sps:$4 sm:$0xff]   ;;  %v3034_v60 = vld [vmem:[%s4146_s4] ss:$12 sps:$4 sm:$0xff]  }
  0x5a   :  { %v3033_v56 = vld [vmem:[%s4146_s4 + $0x1c] ss:$12 sps:$4 sm:$0xff]   ;;  %v3031_v58 = vld [vmem:[%s4146_s4 + $0x18] ss:$12 sps:$4 sm:$0xff]   ;;  %v3044_v63 = vld [vmem:[%s4146_s4 + $0x154] ss:$12 sps:$4 sm:$0xff]  }
  0x5b   :  { %2869 = vmatpush3.bf16.msra.mxu0 %v3051_v45  ;;  %v3036_v59 = vld [vmem:[%s4146_s4 + $0x4] ss:$12 sps:$4 sm:$0xff]   ;;  %v3039_v61 = vld [vmem:[%s4146_s4 + $0x16c] ss:$12 sps:$4 sm:$0xff]   ;;  %v3037_v62 = vld [vmem:[%s4146_s4 + $0x168] ss:$12 sps:$4 sm:$0xff]  }
  0x5c   :  { %500 = vmatpush1.bf16.msra.mxu1 %v3012_v30  ;;  %2870 = vmatprep.subr.bf16.mxu0 %v3055_v48  ;;  %v3042_v0 = vld [vmem:[%s4146_s4 + $0x150] ss:$12 sps:$4 sm:$0xff]   ;;  %v3047_v2 = vld [vmem:[%s4146_s4 + $0x138] ss:$12 sps:$4 sm:$0xff]   ;;  %v3052_v4 = vld [vmem:[%s4146_s4 + $0x120] ss:$12 sps:$4 sm:$0xff]  }
  0x5d   :  { %867 = vmatprep.subr.bf16.mxu1 %v3015_v32  ;;  %v3049_v1 = vld [vmem:[%s4146_s4 + $0x13c] ss:$12 sps:$4 sm:$0xff]   ;;  %v3054_v3 = vld [vmem:[%s4146_s4 + $0x124] ss:$12 sps:$4 sm:$0xff]   ;;  %v3059_v5 = vld [vmem:[%s4146_s4 + $0x10c] ss:$12 sps:$4 sm:$0xff]  }
  0x5e   :  { %v3057_v6 = vld [vmem:[%s4146_s4 + $0x108] ss:$12 sps:$4 sm:$0xff]   ;;  %v3062_v8 = vld [vmem:[%s4146_s4 + $0xf0] ss:$12 sps:$4 sm:$0xff]   ;;  %v3070_v10 = vld [vmem:[%s4146_s4 + $0xe0] ss:$12 sps:$4 sm:$0xff]  }
  0x5f   :  { %2641 = vmatmul.mubr.msk.bf16.vlgmr.msra.gmra.mxu1 %vm481_vm0, %v420_v33  ;;  %2871 = vmatpush3.bf16.msra.mxu0 %v3056_v49  ;;  %v3064_v7 = vld [vmem:[%s4146_s4 + $0xf4] ss:$12 sps:$4 sm:$0xff]   ;;  %v3069_v9 = vld [vmem:[%s4146_s4 + $0xdc] ss:$12 sps:$4 sm:$0xff]   ;;  %v3067_v11 = vld [vmem:[%s4146_s4 + $0xd8] ss:$12 sps:$4 sm:$0xff]  }
  0x60   :  { %868 = vmatpush1.bf16.msra.mxu1 %v3013_v34  ;;  %2872 = vmatprep.subr.bf16.mxu0 %v3060_v52  ;;  %v3071_v12 = vld [vmem:[%s4146_s4 + $0x20] ss:$12 sps:$4 sm:$0xff]   ;;  %v3074_v13 = vld [vmem:[%s4146_s4 + $0xc4] ss:$12 sps:$4 sm:$0xff]   ;;  %v3075_v14 = vld [vmem:[%s4146_s4 + $0xc8] ss:$12 sps:$4 sm:$0xff]  }
  0x61   :  { %869 = vmatprep.subr.bf16.mxu1 %v3018_v35  ;;  %v3072_v15 = vld [vmem:[%s4146_s4 + $0xc0] ss:$12 sps:$4 sm:$0xff]   ;;  %v3076_v16 = vld [vmem:[%s4146_s4 + $0x8] ss:$12 sps:$4 sm:$0xff]   ;;  %v4013_v18 = vshrl.u32 %v431_v17, 7 }
  0x62   :  { %v429_v20 = vld [vmem:[%s4145_s3] sm:$0x3] }
  0x63   :  { %2873 = vmatpush3.bf16.msra.mxu0 %v3061_v53  ;;  %v4016_v19 = vsub.s32 0, %v4013_v18  ;;  %v4022_v21 = vsub.s32 1, %v4013_v18  ;;  %v594_v35 = vld [vmem:[%s4147_s5] sm:$0x7]  ;;  %v606_v37 = vsub.s32 2, %v4013_v18 }
  0x64   :  { %870 = vmatpush1.bf16.msra.mxu1 %v3016_v38  ;;  %2874 = vmatprep.subr.bf16.mxu0 %v3065_v55 }
  0x65   :  { %871 = vmatprep.subr.bf16.mxu1 %v3021_v39  ;;  %v434_v22 = vrot.slane %v429_v20, %v4016_v19  ;;  %v438_v23 = vrot.slane %v429_v20, %v4022_v21  ;;  %v599_v36 = vrot.slane %v594_v35, %v4016_v19  ;;  %v603_v38 = vrot.slane %v594_v35, %v4022_v21 }
  0x67   :  { %2875 = vmatpush3.bf16.msra.mxu0 %v3066_v57 }
  0x68   :  { %872 = vmatpush1.bf16.msra.mxu1 %v3019_v42  ;;  %2876 = vmatprep.subr.bf16.mxu0 %v3070_v10  ;;  %v607_v42 = vrot.slane %v594_v35, %v606_v37 }
  0x69   :  { %873 = vmatprep.subr.bf16.mxu1 %v3024_v43 }
  0x6b   :  { %2877 = vmatpush3.bf16.msra.mxu0 %v3071_v12 }
  0x6c   :  { %874 = vmatpush1.bf16.msra.mxu1 %v3022_v46  ;;  %2878 = vmatprep.subr.bf16.mxu0 %v3075_v14 }
  0x6d   :  { %875 = vmatprep.subr.bf16.mxu1 %v3027_v47 }
  0x6f   :  { %2879 = vmatpush3.bf16.msra.mxu0 %v3076_v16 }
  0x70   :  { %876 = vmatpush1.bf16.msra.mxu1 %v3025_v50 }
  0x71   :  { %877 = vmatprep.subr.bf16.mxu1 %v3030_v51 }
  0x74   :  { %878 = vmatpush1.bf16.msra.mxu1 %v3028_v54 }
  0x75   :  { %879 = vmatprep.subr.bf16.mxu1 %v3033_v56 }
  0x78   :  { %880 = vmatpush1.bf16.msra.mxu1 %v3031_v58 }
  0x79   :  { %881 = vmatprep.subr.bf16.mxu1 %v3036_v59 }
  0x7c   :  { %882 = vmatpush1.bf16.msra.mxu1 %v3034_v60 }
  0x7d   :  { %883 = vmatprep.subr.bf16.mxu1 %v3039_v61 }
  0x80   :  { %884 = vmatpush2.bf16.msra.mxu1 %v3037_v62 }
  0x81   :  { %885 = vmatprep.subr.bf16.mxu1 %v3044_v63 }
  0x84   :  { %886 = vmatpush2.bf16.msra.mxu1 %v3042_v0 }
  0x85   :  { %887 = vmatprep.subr.bf16.mxu1 %v3049_v1 }
  0x88   :  { %888 = vmatpush2.bf16.msra.mxu1 %v3047_v2 }
  0x89   :  { %889 = vmatprep.subr.bf16.mxu1 %v3054_v3 }
  0x8c   :  { %890 = vmatpush2.bf16.msra.mxu1 %v3052_v4 }
  0x8d   :  { %891 = vmatprep.subr.bf16.mxu1 %v3059_v5 }
  0x90   :  { %892 = vmatpush2.bf16.msra.mxu1 %v3057_v6 }
  0x91   :  { %893 = vmatprep.subr.bf16.mxu1 %v3064_v7 }
  0x94   :  { %894 = vmatpush2.bf16.msra.mxu1 %v3062_v8 }
  0x95   :  { %895 = vmatprep.subr.bf16.mxu1 %v3069_v9 }
  0x98   :  { %896 = vmatpush2.bf16.msra.mxu1 %v3067_v11 }
  0x99   :  { %897 = vmatprep.subr.bf16.mxu1 %v3074_v13 }
  0x9c   :  { %898 = vmatpush2.bf16.msra.mxu1 %v3072_v15 }
 0x11f   :  { %v519_v25 = vpop.f32.mrf.mxu1 }
 0x120   :  { %v520_v26 = vadd.f32 %v519_v25, %v434_v22 }
 0x121   :  { %v521_v27 = vpop.f32.mrf.mxu1 }
 0x122   :  { %v522_v28 = vadd.f32 %v521_v27, %v438_v23  ;;  %v526_v29 = vmax.f32 %v520_v26, 0.0 }
 0x123   :  { %v523_v30 = vpop.f32.mrf.mxu1 }
 0x124   :  { %v527_v31 = vmax.f32 %v522_v28, 0.0  ;;  %v528_v34 = vpack.c.bf16 %v526_v29, %v526_v29 }
 0x125   :  { %v524_v32 = vpop.f32.mrf.mxu1 }
 0x126   :  { %v529_v33 = vpack.c.bf16 %v527_v31, %v527_v31 }
 0x128   :  { %899 = vmatprep.mubr.bf16.mxu1 %v529_v33  ;;  %940 = vmatprep.mubr.bf16.mxu0 %v529_v33 }
 0x129   :  { %900 = vmatmul.mubr.bf16.vlgmr.msra.gmra.mxu1 %v528_v34  ;;  %941 = vmatmul.mubr.bf16.vlgmr.msra.gmra.mxu0 %v528_v34 }
 0x1e9   :  { %v901_v39 = vpop.f32.mrf.mxu1  ;;  %v2880_v40 = vpop.f32.mrf.mxu0 }
 0x1ea   :  { %v4032_v41 = vadd.f32 %v901_v39, %v599_v36 }
 0x1eb   :  { %v903_v43 = vpop.f32.mrf.mxu1  ;;  %v2881_v44 = vpop.f32.mrf.mxu0 }
 0x1ec   :  { %v948_v45 = vmax.f32 %v4032_v41, 0.0  ;;  %v4037_v46 = vadd.f32 %v903_v43, %v603_v38  ;;  %v2882_v47 = vadd.f32 %v2881_v44, %v2880_v40 }
 0x1ed   :  { %v905_v48 = vpop.f32.mrf.mxu1  ;;  %v2883_v49 = vpop.f32.mrf.mxu0 }
 0x1ee   :  { %v949_v50 = vmax.f32 %v4037_v46, 0.0  ;;  %v4040_v51 = vadd.f32 %v2882_v47, %v607_v42 }
 0x1ef   :  { %v906_v52 = vpop.f32.mrf.mxu1  ;;  %v2884_v53 = vpop.f32.mrf.mxu0 }
 0x1f0   :  { %v950_v54 = vmax.f32 %v4040_v51, 0.0 }
 0x1f1   :  { %3320 = dma.done.wait [#allocation4], 6912 }
 0x1f2   :  { %3321 = vsyncadd [#allocation4], 4294960384 }
 0x1f3   :  { %3322 = dma.done.wait [#allocation4 + $0x1], 12288 }
 0x1f4   :  { %3323 = vsyncadd [#allocation4 + $0x1], 4294955008  ;;  %v3077_v55 = vld [vmem:[#allocation3 + $0xac] ss:$12 sps:$4 sm:$0xff]   ;;  %v3081_v57 = vld [vmem:[#allocation3 + $0xa8] ss:$12 sps:$4 sm:$0xff]  }
 0x1f5   :  { %v3079_v56 = vld [vmem:[#allocation3 + $0x22c] ss:$12 sps:$4 sm:$0xff]   ;;  %1701 = vmatprep.subr.bf16.mxu0 %v3077_v55  ;;  %v3082_v58 = vld [vmem:[#allocation3 + $0x228] ss:$12 sps:$4 sm:$0xff]   ;;  %v3087_v61 = vld [vmem:[#allocation3 + $0x90] ss:$12 sps:$4 sm:$0xff]  }
 0x1f6   :  { %1742 = vmatprep.subr.bf16.mxu1 %v3079_v56  ;;  %v3083_v59 = vld [vmem:[#allocation3 + $0x94] ss:$12 sps:$4 sm:$0xff]   ;;  %1702 = vmatpush1.bf16.msra.mxu0 %v3081_v57  ;;  %v3088_v62 = vld [vmem:[#allocation3 + $0x210] ss:$12 sps:$4 sm:$0xff]   ;;  %v3093_v1 = vld [vmem:[#allocation3 + $0x78] ss:$12 sps:$4 sm:$0xff]  }
 0x1f7   :  { %1743 = vmatpush1.bf16.msra.mxu1 %v3082_v58  ;;  %v3085_v60 = vld [vmem:[#allocation3 + $0x214] ss:$12 sps:$4 sm:$0xff]   ;;  %1703 = vmatprep.subr.bf16.mxu0 %v3083_v59  ;;  %v3089_v63 = vld [vmem:[#allocation3 + $0x7c] ss:$12 sps:$4 sm:$0xff]   ;;  %v3094_v2 = vld [vmem:[#allocation3 + $0x1f8] ss:$12 sps:$4 sm:$0xff]  }
 0x1f8   :  { %1744 = vmatprep.subr.bf16.mxu1 %v3085_v60  ;;  %v3091_v0 = vld [vmem:[#allocation3 + $0x1fc] ss:$12 sps:$4 sm:$0xff]   ;;  %v3095_v3 = vld [vmem:[#allocation3 + $0x64] ss:$12 sps:$4 sm:$0xff]   ;;  %v3099_v5 = vld [vmem:[#allocation3 + $0x60] ss:$12 sps:$4 sm:$0xff]  }
 0x1f9   :  { %v3097_v4 = vld [vmem:[#allocation3 + $0x1e4] ss:$12 sps:$4 sm:$0xff]   ;;  %v3100_v6 = vld [vmem:[#allocation3 + $0x1e0] ss:$12 sps:$4 sm:$0xff]   ;;  %v3105_v9 = vld [vmem:[#allocation3 + $0x48] ss:$12 sps:$4 sm:$0xff]  }
 0x1fa   :  { %1704 = vmatpush1.bf16.msra.mxu0 %v3087_v61  ;;  %v3101_v7 = vld [vmem:[#allocation3 + $0x4c] ss:$12 sps:$4 sm:$0xff]   ;;  %v3106_v10 = vld [vmem:[#allocation3 + $0x1c8] ss:$12 sps:$4 sm:$0xff]   ;;  %v3111_v13 = vld [vmem:[#allocation3 + $0x30] ss:$12 sps:$4 sm:$0xff]  }
 0x1fb   :  { %1745 = vmatpush1.bf16.msra.mxu1 %v3088_v62  ;;  %1705 = vmatprep.subr.bf16.mxu0 %v3089_v63  ;;  %v3103_v8 = vld [vmem:[#allocation3 + $0x1cc] ss:$12 sps:$4 sm:$0xff]   ;;  %v3107_v11 = vld [vmem:[#allocation3 + $0x34] ss:$12 sps:$4 sm:$0xff]   ;;  %v3112_v14 = vld [vmem:[#allocation3 + $0x1b0] ss:$12 sps:$4 sm:$0xff]  }
 0x1fc   :  { %1746 = vmatprep.subr.bf16.mxu1 %v3091_v0  ;;  %v3109_v12 = vld [vmem:[#allocation3 + $0x1b4] ss:$12 sps:$4 sm:$0xff]   ;;  %v3113_v15 = vld [vmem:[#allocation3 + $0x1c] ss:$12 sps:$4 sm:$0xff]   ;;  %v3117_v17 = vld [vmem:[#allocation3 + $0x18] ss:$12 sps:$4 sm:$0xff]  }
 0x1fd   :  { %v3115_v16 = vld [vmem:[#allocation3 + $0x19c] ss:$12 sps:$4 sm:$0xff]   ;;  %v3118_v20 = vld [vmem:[#allocation3 + $0x198] ss:$12 sps:$4 sm:$0xff]   ;;  %v3123_v25 = vld [vmem:[#allocation3] ss:$12 sps:$4 sm:$0xff]  }
 0x1fe   :  { %1706 = vmatpush1.bf16.msra.mxu0 %v3093_v1  ;;  %v3119_v22 = vld [vmem:[#allocation3 + $0x4] ss:$12 sps:$4 sm:$0xff]   ;;  %v3124_v26 = vld [vmem:[#allocation3 + $0x180] ss:$12 sps:$4 sm:$0xff]   ;;  %v3129_v29 = vld [vmem:[#allocation3 + $0x168] ss:$12 sps:$4 sm:$0xff]  }
 0x1ff   :  { %1747 = vmatpush1.bf16.msra.mxu1 %v3094_v2  ;;  %1707 = vmatprep.subr.bf16.mxu0 %v3095_v3  ;;  %v3121_v23 = vld [vmem:[#allocation3 + $0x184] ss:$12 sps:$4 sm:$0xff]   ;;  %v3125_v27 = vld [vmem:[#allocation3 + $0x16c] ss:$12 sps:$4 sm:$0xff]   ;;  %v3130_v30 = vld [vmem:[#allocation3 + $0x2e8] ss:$12 sps:$4 sm:$0xff]  }
 0x200   :  { %1748 = vmatprep.subr.bf16.mxu1 %v3097_v4  ;;  %v3127_v28 = vld [vmem:[#allocation3 + $0x2ec] ss:$12 sps:$4 sm:$0xff]   ;;  %v3327_v31 = vmov 1983009808   ;;  %v3131_v33 = vld [vmem:[#allocation3 + $0x154] ss:$12 sps:$4 sm:$0xff]  }
 0x201   :  { %v1038_v32 = vunpack.c.l.s4 %v3327_v31  ;;  %v3133_v34 = vld [vmem:[#allocation3 + $0x2d4] ss:$12 sps:$4 sm:$0xff]   ;;  %v3135_v35 = vld [vmem:[#allocation3 + $0x150] ss:$12 sps:$4 sm:$0xff]   ;;  %v3141_v42 = vld [vmem:[#allocation3 + $0x138] ss:$12 sps:$4 sm:$0xff]  }
 0x202   :  { %1708 = vmatpush1.bf16.msra.mxu0 %v3099_v5  ;;  %v3136_v38 = vld [vmem:[#allocation3 + $0x2d0] ss:$12 sps:$4 sm:$0xff]   ;;  %v3142_v43 = vld [vmem:[#allocation3 + $0x2b8] ss:$12 sps:$4 sm:$0xff]   ;;  %v3147_v49 = vld [vmem:[#allocation3 + $0x120] ss:$12 sps:$4 sm:$0xff]  }
 0x203   :  { %1749 = vmatpush1.bf16.msra.mxu1 %v3100_v6  ;;  %1709 = vmatprep.subr.bf16.mxu0 %v3101_v7  ;;  %v1039_v36 = vunpack.c.0.s8 %v1038_v32  ;;  %v3137_v39 = vld [vmem:[#allocation3 + $0x13c] ss:$12 sps:$4 sm:$0xff]   ;;  %v3143_v47 = vld [vmem:[#allocation3 + $0x124] ss:$12 sps:$4 sm:$0xff]   ;;  %v3148_v53 = vld [vmem:[#allocation3 + $0x2a0] ss:$12 sps:$4 sm:$0xff]  }
 0x204   :  { %1750 = vmatprep.subr.bf16.mxu1 %v3103_v8  ;;  %v3139_v40 = vld [vmem:[#allocation3 + $0x2bc] ss:$12 sps:$4 sm:$0xff]   ;;  %v3145_v48 = vld [vmem:[#allocation3 + $0x2a4] ss:$12 sps:$4 sm:$0xff]   ;;  %v3149_v57 = vld [vmem:[#allocation3 + $0x10c] ss:$12 sps:$4 sm:$0xff]  }
 0x205   :  { %v1042_v44 = vsub.s32 %v1039_v36, %v4013_v18  ;;  %v1034_v52 = vld [vmem:[%s4143_s1] sm:$0xff]  ;;  %v3151_v58 = vld [vmem:[#allocation3 + $0x28c] ss:$12 sps:$4 sm:$0xff]   ;;  %v3161_v6 = vld [vmem:[#allocation3 + $0xdc] ss:$12 sps:$4 sm:$0xff]   ;;  %vm2151_vm1 = vcmask 261120  }
 0x206   :  { %1710 = vmatpush1.bf16.msra.mxu0 %v3105_v9  ;;  %v1036_v56 = vcombine.high %v1034_v52, %v1034_v52  ;;  %v3153_v61 = vld [vmem:[#allocation3 + $0x108] ss:$12 sps:$4 sm:$0xff]   ;;  %v3159_v4 = vld [vmem:[#allocation3 + $0xf0] ss:$12 sps:$4 sm:$0xff]   ;;  %v3165_v8 = vld [vmem:[#allocation3 + $0xd8] ss:$12 sps:$4 sm:$0xff]  }
 0x207   :  { %1751 = vmatpush1.bf16.msra.mxu1 %v3106_v10  ;;  %1711 = vmatprep.subr.bf16.mxu0 %v3107_v11  ;;  %v1043_v55 = vrot.slane %v1034_v52, %v1042_v44  ;;  %v3154_v62 = vld [vmem:[#allocation3 + $0x288] ss:$12 sps:$4 sm:$0xff]   ;;  %v3160_v5 = vld [vmem:[#allocation3 + $0x270] ss:$12 sps:$4 sm:$0xff]   ;;  %v3166_v9 = vld [vmem:[#allocation3 + $0x258] ss:$12 sps:$4 sm:$0xff]  }
 0x208   :  { %1752 = vmatprep.subr.bf16.mxu1 %v3109_v12  ;;  %v1050_v60 = vrot.slane %v1036_v56, %v1042_v44  ;;  %v3155_v1 = vld [vmem:[#allocation3 + $0xf4] ss:$12 sps:$4 sm:$0xff]   ;;  %v3163_v7 = vld [vmem:[#allocation3 + $0x25c] ss:$12 sps:$4 sm:$0xff]   ;;  %v3167_v10 = vld [vmem:[#allocation3 + $0xc4] ss:$12 sps:$4 sm:$0xff]  }
 0x209   :  { %v1051_v59 = vcombine.high %v1043_v55, %v1043_v55  ;;  %v3157_v2 = vld [vmem:[#allocation3 + $0x274] ss:$12 sps:$4 sm:$0xff]   ;;  %v3169_v11 = vld [vmem:[#allocation3 + $0x244] ss:$12 sps:$4 sm:$0xff]   ;;  %vm3329_vm2 = vmmov 0   ;;  %vm2577_vm3 = vcmask 25600  }
 0x20a   :  { %1712 = vmatpush1.bf16.msra.mxu0 %v3111_v13  ;;  %v1052_v0 = vcombine.high %v1050_v60, %v1050_v60  ;;  %v3171_v12 = vld [vmem:[#allocation3 + $0xc0] ss:$12 sps:$4 sm:$0xff]   ;;  %v3186_v32 = vld [vmem:[#allocation3 + $0x128] ss:$12 sps:$4 sm:$0xff]   ;;  %v3190_v36 = vld [vmem:[#allocation3 + $0x110] ss:$12 sps:$4 sm:$0xff]  }
 0x20b   :  { %1753 = vmatpush1.bf16.msra.mxu1 %v3112_v14  ;;  %1713 = vmatprep.subr.bf16.mxu0 %v3113_v15  ;;  %v1058_v63 = vpack.c.bf16 %v1051_v59, %v1051_v59  ;;  %v3172_v13 = vld [vmem:[#allocation3 + $0x240] ss:$12 sps:$4 sm:$0xff]   ;;  %v3174_v14 = vld [vmem:[#allocation3 + $0x170] ss:$12 sps:$4 sm:$0xff]   ;;  %v3196_v44 = vld [vmem:[#allocation3 + $0x38] ss:$12 sps:$4 sm:$0xff]  }
 0x20c   :  { %1754 = vmatprep.subr.bf16.mxu1 %v3115_v16  ;;  %v1060_v3 = vpack.c.bf16 %v1052_v0, %v1052_v0  ;;  %v3175_v15 = vld [vmem:[#allocation3 + $0x2f0] ss:$12 sps:$4 sm:$0xff]   ;;  %v3185_v31 = vld [vmem:[#allocation3 + $0x200] ss:$12 sps:$4 sm:$0xff]   ;;  %v3203_v56 = vld [vmem:[#allocation3 + $0x248] ss:$12 sps:$4 sm:$0xff]  }
 0x20d   :  { %1733 = vmatprep.mubr.bf16.mxu0 %v1058_v63  ;;  %v3176_v16 = vld [vmem:[#allocation3 + $0xb0] ss:$12 sps:$4 sm:$0xff]   ;;  %v3200_v52 = vld [vmem:[#allocation3 + $0x20] ss:$12 sps:$4 sm:$0xff]   ;;  %v3266_v41 = vld [vmem:[#allocation2 + $0x108] ss:$12 sps:$4 sm:$0xff]  }
 0x20e   :  { %1714 = vmatpush1.bf16.msra.mxu0 %v3117_v17  ;;  %1774 = vmatprep.mubr.bf16.mxu1 %v1060_v3  ;;  %v4047_v17 = vpack.c.bf16 %v1043_v55, %v1043_v55  ;;  %v3202_v55 = vld [vmem:[#allocation3 + $0xc8] ss:$12 sps:$4 sm:$0xff]   ;;  %v3231_v51 = vld [vmem:[#allocation2 + $0x140] ss:$12 sps:$4 sm:$0xff]  }
 0x20f   :  { %1755 = vmatpush1.bf16.msra.mxu1 %v3118_v20  ;;  %1715 = vmatprep.subr.bf16.mxu0 %v3119_v22  ;;  %v4049_v20 = vpack.c.bf16 %v1050_v60, %v1050_v60  ;;  %v3177_v22 = vld [vmem:[#allocation3 + $0x230] ss:$12 sps:$4 sm:$0xff]   ;;  %v3211_v60 = vld [vmem:[#allocation2 + $0x19c] ss:$12 sps:$4 sm:$0xff]   ;;  %v3217_v0 = vld [vmem:[#allocation2 + $0x184] ss:$12 sps:$4 sm:$0xff]  }
 0x210   :  { %1756 = vmatprep.subr.bf16.mxu1 %v3121_v23  ;;  %v3178_v23 = vld [vmem:[#allocation3 + $0x158] ss:$12 sps:$4 sm:$0xff]   ;;  %v3208_v59 = vld [vmem:[#allocation2 + $0xac] ss:$12 sps:$4 sm:$0xff]   ;;  %v3225_v46 = vld [vmem:[#allocation2 + $0x64] ss:$12 sps:$4 sm:$0xff]  }
 0x212   :  { %1716 = vmatpush1.bf16.msra.mxu0 %v3123_v25  ;;  %v3179_v25 = vld [vmem:[#allocation3 + $0x2d8] ss:$12 sps:$4 sm:$0xff]  }
 0x213   :  { %1757 = vmatpush1.bf16.msra.mxu1 %v3124_v26  ;;  %1717 = vmatprep.subr.bf16.mxu0 %v3125_v27  ;;  %v3180_v26 = vld [vmem:[#allocation3 + $0x98] ss:$12 sps:$4 sm:$0xff]  }
 0x214   :  { %1758 = vmatprep.subr.bf16.mxu1 %v3127_v28  ;;  %v3181_v27 = vld [vmem:[#allocation3 + $0x218] ss:$12 sps:$4 sm:$0xff]   ;;  %v3182_v28 = vld [vmem:[#allocation3 + $0x140] ss:$12 sps:$4 sm:$0xff]  }
 0x216   :  { %1718 = vmatpush2.bf16.msra.mxu0 %v3129_v29  ;;  %v3183_v29 = vld [vmem:[#allocation3 + $0x2c0] ss:$12 sps:$4 sm:$0xff]  }
 0x217   :  { %1759 = vmatpush2.bf16.msra.mxu1 %v3130_v30  ;;  %1719 = vmatprep.subr.bf16.mxu0 %v3131_v33  ;;  %v3184_v30 = vld [vmem:[#allocation3 + $0x80] ss:$12 sps:$4 sm:$0xff]   ;;  %v3187_v33 = vld [vmem:[#allocation3 + $0x2a8] ss:$12 sps:$4 sm:$0xff]  }
 0x218   :  { %1760 = vmatprep.subr.bf16.mxu1 %v3133_v34  ;;  %v3188_v34 = vld [vmem:[#allocation3 + $0x68] ss:$12 sps:$4 sm:$0xff]  }
 0x21a   :  { %1720 = vmatpush2.bf16.msra.mxu0 %v3135_v35  ;;  %v3189_v35 = vld [vmem:[#allocation3 + $0x1e8] ss:$12 sps:$4 sm:$0xff]  }
 0x21b   :  { %1761 = vmatpush2.bf16.msra.mxu1 %v3136_v38  ;;  %1721 = vmatprep.subr.bf16.mxu0 %v3137_v39  ;;  %v3191_v38 = vld [vmem:[#allocation3 + $0x290] ss:$12 sps:$4 sm:$0xff]  }
 0x21c   :  { %1762 = vmatprep.subr.bf16.mxu1 %v3139_v40  ;;  %v3192_v39 = vld [vmem:[#allocation3 + $0x50] ss:$12 sps:$4 sm:$0xff]  }
 0x21d   :  { %v3193_v40 = vld [vmem:[#allocation3 + $0x1d0] ss:$12 sps:$4 sm:$0xff]  }
 0x21e   :  { %1722 = vmatpush2.bf16.msra.mxu0 %v3141_v42  ;;  %v3194_v42 = vld [vmem:[#allocation3 + $0xf8] ss:$12 sps:$4 sm:$0xff]  }
 0x21f   :  { %1763 = vmatpush2.bf16.msra.mxu1 %v3142_v43  ;;  %1723 = vmatprep.subr.bf16.mxu0 %v3143_v47  ;;  %v3195_v43 = vld [vmem:[#allocation3 + $0x278] ss:$12 sps:$4 sm:$0xff]  }
 0x220   :  { %1764 = vmatprep.subr.bf16.mxu1 %v3145_v48  ;;  %v3197_v47 = vld [vmem:[#allocation3 + $0x1b8] ss:$12 sps:$4 sm:$0xff]   ;;  %v3198_v48 = vld [vmem:[#allocation3 + $0xe0] ss:$12 sps:$4 sm:$0xff]  }
 0x222   :  { %1724 = vmatpush2.bf16.msra.mxu0 %v3147_v49  ;;  %v3199_v49 = vld [vmem:[#allocation3 + $0x260] ss:$12 sps:$4 sm:$0xff]  }
 0x223   :  { %1765 = vmatpush2.bf16.msra.mxu1 %v3148_v53  ;;  %1725 = vmatprep.subr.bf16.mxu0 %v3149_v57  ;;  %v3201_v53 = vld [vmem:[#allocation3 + $0x1a0] ss:$12 sps:$4 sm:$0xff]   ;;  %v3204_v57 = vld [vmem:[#allocation3 + $0x8] ss:$12 sps:$4 sm:$0xff]  }
 0x224   :  { %1766 = vmatprep.subr.bf16.mxu1 %v3151_v58  ;;  %v3205_v58 = vld [vmem:[#allocation3 + $0x188] ss:$12 sps:$4 sm:$0xff]  }
 0x226   :  { %1726 = vmatpush2.bf16.msra.mxu0 %v3153_v61  ;;  %v3206_v61 = vld [vmem:[#allocation2 + $0xa8] ss:$12 sps:$4 sm:$0xff]  }
 0x227   :  { %1767 = vmatpush2.bf16.msra.mxu1 %v3154_v62  ;;  %1727 = vmatprep.subr.bf16.mxu0 %v3155_v1  ;;  %v3209_v62 = vld [vmem:[#allocation2 + $0x198] ss:$12 sps:$4 sm:$0xff]   ;;  %v3212_v1 = vld [vmem:[#allocation2 + $0x90] ss:$12 sps:$4 sm:$0xff]  }
 0x228   :  { %1768 = vmatprep.subr.bf16.mxu1 %v3157_v2  ;;  %v3215_v2 = vld [vmem:[#allocation2 + $0x180] ss:$12 sps:$4 sm:$0xff]  }
 0x22a   :  { %1728 = vmatpush2.bf16.msra.mxu0 %v3159_v4  ;;  %v3220_v4 = vld [vmem:[#allocation2 + $0x7c] ss:$12 sps:$4 sm:$0xff]  }
 0x22b   :  { %1769 = vmatpush2.bf16.msra.mxu1 %v3160_v5  ;;  %1729 = vmatprep.subr.bf16.mxu0 %v3161_v6  ;;  %v3221_v5 = vld [vmem:[#allocation2 + $0x170] ss:$12 sps:$4 sm:$0xff]   ;;  %v3218_v6 = vld [vmem:[#allocation2 + $0x78] ss:$12 sps:$4 sm:$0xff]  }
 0x22c   :  { %1770 = vmatprep.subr.bf16.mxu1 %v3163_v7  ;;  %v4062_v7 = vpack.c.bf16 %v950_v54, %v950_v54  ;;  %v3228_v54 = vld [vmem:[#allocation2 + $0x48] ss:$12 sps:$4 sm:$0xff]  }
 0x22e   :  { %1730 = vmatpush2.bf16.msra.mxu0 %v3165_v8  ;;  %v3222_v8 = vld [vmem:[#allocation2 + $0xb0] ss:$12 sps:$4 sm:$0xff]  }
 0x22f   :  { %1771 = vmatpush2.bf16.msra.mxu1 %v3166_v9  ;;  %1731 = vmatprep.subr.bf16.mxu0 %v3167_v10  ;;  %v3223_v9 = vld [vmem:[#allocation2 + $0x60] ss:$12 sps:$4 sm:$0xff]  }
 0x230   :  { %1772 = vmatprep.subr.bf16.mxu1 %v3169_v11  ;;  %v3230_v10 = vld [vmem:[#allocation2 + $0x4c] ss:$12 sps:$4 sm:$0xff]  }
 0x231   :  { %v3232_v11 = vld [vmem:[#allocation2 + $0x80] ss:$12 sps:$4 sm:$0xff]  }
 0x232   :  { %1732 = vmatpush2.bf16.msra.mxu0 %v3171_v12  ;;  %v3235_v12 = vld [vmem:[#allocation2 + $0x34] ss:$12 sps:$4 sm:$0xff]  }
 0x233   :  { %1773 = vmatpush2.bf16.msra.mxu1 %v3172_v13  ;;  %2886 = vmatprep.subr.bf16.mxu0 %v3174_v14  ;;  %v3236_v13 = vld [vmem:[#allocation2 + $0x128] ss:$12 sps:$4 sm:$0xff]   ;;  %v3233_v14 = vld [vmem:[#allocation2 + $0x30] ss:$12 sps:$4 sm:$0xff]  }
 0x234   :  { %2908 = vmatprep.subr.bf16.mxu1 %v3175_v15  ;;  %v3237_v15 = vld [vmem:[#allocation2 + $0x68] ss:$12 sps:$4 sm:$0xff]  }
 0x235   :  { %1734 = vmatmul.mubr.bf16.vlgmr.msra.gmra.mxu0 %v4047_v17 }
 0x236   :  { %1775 = vmatmul.mubr.bf16.vlgmr.msra.gmra.mxu1 %v4049_v20  ;;  %2887 = vmatpush3.bf16.msra.mxu0 %v3176_v16  ;;  %v3240_v16 = vld [vmem:[#allocation2 + $0x1c] ss:$12 sps:$4 sm:$0xff]  }
 0x237   :  { %2909 = vmatpush3.bf16.msra.mxu1 %v3177_v22  ;;  %2888 = vmatprep.subr.bf16.mxu0 %v3178_v23  ;;  %v3242_v22 = vld [vmem:[#allocation2 + $0x50] ss:$12 sps:$4 sm:$0xff]  }
 0x238   :  { %2910 = vmatprep.subr.bf16.mxu1 %v3179_v25  ;;  %1815 = vmatprep.mubr.bf16.mxu0 %v1058_v63  ;;  %v3214_v63 = vld [vmem:[#allocation2 + $0x94] ss:$12 sps:$4 sm:$0xff]   ;;  %v3245_v23 = vld [vmem:[#allocation2 + $0x4] ss:$12 sps:$4 sm:$0xff]  }
 0x239   :  { %1855 = vmatprep.mubr.bf16.mxu1 %v1060_v3  ;;  %v960_v3 = vpack.c.bf16 %v949_v50, %v949_v50  ;;  %v3226_v50 = vld [vmem:[#allocation2 + $0x158] ss:$12 sps:$4 sm:$0xff]  }
 0x23a   :  { %2889 = vmatpush3.bf16.msra.mxu0 %v3180_v26  ;;  %v3246_v25 = vld [vmem:[#allocation2 + $0xf8] ss:$12 sps:$4 sm:$0xff]   ;;  %v3243_v26 = vld [vmem:[#allocation2] ss:$12 sps:$4 sm:$0xff]  }
 0x23b   :  { %2911 = vmatpush3.bf16.msra.mxu1 %v3181_v27  ;;  %2890 = vmatprep.subr.bf16.mxu0 %v3182_v28  ;;  %v3247_v27 = vld [vmem:[#allocation2 + $0x38] ss:$12 sps:$4 sm:$0xff]  }
 0x23c   :  { %2912 = vmatprep.subr.bf16.mxu1 %v3183_v29  ;;  %v3250_v28 = vld [vmem:[#allocation2 + $0x16c] ss:$12 sps:$4 sm:$0xff]  }
 0x23d   :  { %v3251_v29 = vld [vmem:[#allocation2 + $0xe0] ss:$12 sps:$4 sm:$0xff]  }
 0x23e   :  { %2891 = vmatpush3.bf16.msra.mxu0 %v3184_v30  ;;  %v3248_v30 = vld [vmem:[#allocation2 + $0x168] ss:$12 sps:$4 sm:$0xff]  }
 0x23f   :  { %2913 = vmatpush3.bf16.msra.mxu1 %v3185_v31  ;;  %2892 = vmatprep.subr.bf16.mxu0 %v3186_v32  ;;  %v3252_v31 = vld [vmem:[#allocation2 + $0x20] ss:$12 sps:$4 sm:$0xff]  }
 0x240   :  { %2914 = vmatprep.subr.bf16.mxu1 %v3187_v33  ;;  %v3255_v32 = vld [vmem:[#allocation2 + $0x154] ss:$12 sps:$4 sm:$0xff]  }
 0x241   :  { %v3256_v33 = vld [vmem:[#allocation2 + $0xc8] ss:$12 sps:$4 sm:$0xff]  }
 0x242   :  { %2893 = vmatpush3.bf16.msra.mxu0 %v3188_v34  ;;  %v3253_v34 = vld [vmem:[#allocation2 + $0x150] ss:$12 sps:$4 sm:$0xff]  }
 0x243   :  { %2915 = vmatpush3.bf16.msra.mxu1 %v3189_v35  ;;  %2894 = vmatprep.subr.bf16.mxu0 %v3190_v36  ;;  %v3257_v35 = vld [vmem:[#allocation2 + $0x8] ss:$12 sps:$4 sm:$0xff]  }
 0x244   :  { %2916 = vmatprep.subr.bf16.mxu1 %v3191_v38  ;;  %v3260_v36 = vld [vmem:[#allocation2 + $0x13c] ss:$12 sps:$4 sm:$0xff]   ;;  %v959_v38 = vpack.c.bf16 %v948_v45, %v948_v45  ;;  %v3271_v45 = vld [vmem:[#allocation2 + $0xf4] ss:$12 sps:$4 sm:$0xff]  }
 0x246   :  { %2895 = vmatpush3.bf16.msra.mxu0 %v3192_v39  ;;  %v3258_v39 = vld [vmem:[#allocation2 + $0x138] ss:$12 sps:$4 sm:$0xff]  }
 0x247   :  { %2917 = vmatpush3.bf16.msra.mxu1 %v3193_v40  ;;  %2896 = vmatprep.subr.bf16.mxu0 %v3194_v42  ;;  %v3261_v40 = vld [vmem:[#allocation2 + $0x1a0] ss:$12 sps:$4 sm:$0xff]   ;;  %v3328_v42 = vmov 0.0  }
 0x248   :  { %2918 = vmatprep.subr.bf16.mxu1 %v3195_v43  ;;  %v3264_v43 = vld [vmem:[#allocation2 + $0x124] ss:$12 sps:$4 sm:$0xff]  }
 0x24a   :  { %2897 = vmatpush3.bf16.msra.mxu0 %v3196_v44  ;;  %v3262_v44 = vld [vmem:[#allocation2 + $0x120] ss:$12 sps:$4 sm:$0xff]  }
 0x24b   :  { %2919 = vmatpush3.bf16.msra.mxu1 %v3197_v47  ;;  %2898 = vmatprep.subr.bf16.mxu0 %v3198_v48  ;;  %v3265_v47 = vld [vmem:[#allocation2 + $0x188] ss:$12 sps:$4 sm:$0xff]   ;;  %v3268_v48 = vld [vmem:[#allocation2 + $0x10c] ss:$12 sps:$4 sm:$0xff]  }
 0x24c   :  { %2920 = vmatprep.subr.bf16.mxu1 %v3199_v49  ;;  %v3269_v49 = vld [vmem:[#allocation2 + $0xf0] ss:$12 sps:$4 sm:$0xff]  }
 0x24e   :  { %2899 = vmatpush3.bf16.msra.mxu0 %v3200_v52  ;;  %v3274_v52 = vld [vmem:[#allocation2 + $0xdc] ss:$12 sps:$4 sm:$0xff]  }
 0x24f   :  { %2921 = vmatpush3.bf16.msra.mxu1 %v3201_v53  ;;  %2900 = vmatprep.subr.bf16.mxu0 %v3202_v55  ;;  %v3272_v53 = vld [vmem:[#allocation2 + $0xd8] ss:$12 sps:$4 sm:$0xff]  }
 0x250   :  { %2922 = vmatprep.subr.bf16.mxu1 %v3203_v56  ;;  %v3277_v55 = vld [vmem:[#allocation2 + $0xc4] ss:$12 sps:$4 sm:$0xff]   ;;  %v3275_v56 = vld [vmem:[#allocation2 + $0xc0] ss:$12 sps:$4 sm:$0xff]  }
 0x252   :  { %2901 = vmatpush3.bf16.msra.mxu0 %v3204_v57  ;;  %v3278_v57 = vld [vmem:[%s4151_s9 + $0x78] sm:$0xff]  }
 0x253   :  { %2923 = vmatpush3.bf16.msra.mxu1 %v3205_v58  ;;  %2155 = vmatprep.subr.bf16.mxu0 %v3208_v59  ;;  %v3279_v58 = vld [vmem:[%s4151_s9 + $0x38] sm:$0xff]   ;;  %v3280_v59 = vld [vmem:[%s4151_s9 + $0x70] sm:$0xff]  }
 0x254   :  { %2208 = vmatprep.subr.bf16.mxu1 %v3211_v60  ;;  %v3281_v60 = vld [vmem:[%s4151_s9 + $0x88] sm:$0xff]  }
 0x255   :  { %1816 = vmatmul.mubr.bf16.vlgmr.msra.gmra.mxu0 %v4047_v17  ;;  %v3241_v17 = vld [vmem:[#allocation2 + $0x110] ss:$12 sps:$4 sm:$0xff]  }
 0x256   :  { %1856 = vmatmul.mubr.bf16.vlgmr.msra.gmra.mxu1 %v4049_v20  ;;  %2156 = vmatpush1.bf16.msra.mxu0 %v3206_v61  ;;  %v3238_v20 = vld [vmem:[#allocation2 + $0x18] ss:$12 sps:$4 sm:$0xff]   ;;  %v3282_v61 = vld [vmem:[%s4151_s9 + $0x30] sm:$0xff]  }
 0x257   :  { %2209 = vmatpush1.bf16.msra.mxu1 %v3209_v62  ;;  %2157 = vmatprep.subr.bf16.mxu0 %v3214_v63  ;;  %v3283_v62 = vld [vmem:[%s4151_s9 + $0x68] sm:$0xff]   ;;  %v3284_v63 = vld [vmem:[%s4151_s9 + $0x80] sm:$0xff]  }
 0x258   :  { %2210 = vmatprep.subr.bf16.mxu1 %v3217_v0  ;;  %2228 = vmatprep.mubr.bf16.mxu1 %v3326_v24  ;;  %v3227_v24 = vld [vmem:[#allocation2 + $0x98] ss:$12 sps:$4 sm:$0xff]   ;;  %v3285_v0 = vld [vmem:[%s4151_s9 + $0x28] sm:$0xff]  }
 0x259   :  { %2187 = vmatprep.mubr.bf16.mxu0 %v960_v3 }
 0x25a   :  { %2158 = vmatpush1.bf16.msra.mxu0 %v3212_v1  ;;  %v3286_v1 = vld [vmem:[%s4151_s9 + $0x60] sm:$0xff]  }
 0x25b   :  { %2211 = vmatpush1.bf16.msra.mxu1 %v3215_v2  ;;  %2159 = vmatprep.subr.bf16.mxu0 %v3220_v4  ;;  %v3287_v2 = vld [vmem:[%s4151_s9 + $0x20] sm:$0xff]   ;;  %v3289_v4 = vld [vmem:[%s4151_s9 + $0x18] sm:$0xff]  }
 0x25c   :  { %2930 = vmatprep.subr.bf16.mxu1 %v3221_v5  ;;  %v3290_v5 = vld [vmem:[%s4151_s9 + $0x50] sm:$0xff]  }
 0x25e   :  { %2840 = vmatmul.mubr.msk.bf16.vlgmr.msra.gmra.mxu1 %vm2151_vm1, %v4062_v7  ;;  %2160 = vmatpush1.bf16.msra.mxu0 %v3218_v6  ;;  %v3291_v6 = vld [vmem:[%s4151_s9 + $0x10] sm:$0xff]  }
 0x25f   :  { %2931 = vmatpush3.bf16.msra.mxu1 %v3222_v8  ;;  %2161 = vmatprep.subr.bf16.mxu0 %v3225_v46  ;;  %v3293_v8 = vld [vmem:[%s4151_s9 + $0x8] sm:$0xff]   ;;  %v3294_v46 = vld [vmem:[%s4151_s9 + $0x40] sm:$0xff]  }
 0x260   :  { %2932 = vmatprep.subr.bf16.mxu1 %v3226_v50  ;;  %2269 = vmatprep.mubr.bf16.mxu1 %v960_v3  ;;  %v3288_v3 = vld [vmem:[%s4151_s9 + $0x58] sm:$0xff]   ;;  %v3295_v50 = vld [vmem:[%s4151_s9] sm:$0xff]  }
 0x262   :  { %2162 = vmatpush1.bf16.msra.mxu0 %v3223_v9 }
 0x263   :  { %2933 = vmatpush3.bf16.msra.mxu1 %v3227_v24  ;;  %2163 = vmatprep.subr.bf16.mxu0 %v3230_v10 }
 0x264   :  { %2934 = vmatprep.subr.bf16.mxu1 %v3231_v51 }
 0x266   :  { %2164 = vmatpush1.bf16.msra.mxu0 %v3228_v54 }
 0x267   :  { %2935 = vmatpush3.bf16.msra.mxu1 %v3232_v11  ;;  %2165 = vmatprep.subr.bf16.mxu0 %v3235_v12 }
 0x268   :  { %2936 = vmatprep.subr.bf16.mxu1 %v3236_v13 }
 0x26a   :  { %2166 = vmatpush1.bf16.msra.mxu0 %v3233_v14 }
 0x26b   :  { %2937 = vmatpush3.bf16.msra.mxu1 %v3237_v15  ;;  %2167 = vmatprep.subr.bf16.mxu0 %v3240_v16 }
 0x26c   :  { %2938 = vmatprep.subr.bf16.mxu1 %v3241_v17 }
 0x26e   :  { %2168 = vmatpush1.bf16.msra.mxu0 %v3238_v20 }
 0x26f   :  { %2939 = vmatpush3.bf16.msra.mxu1 %v3242_v22  ;;  %2169 = vmatprep.subr.bf16.mxu0 %v3245_v23 }
 0x270   :  { %2940 = vmatprep.subr.bf16.mxu1 %v3246_v25 }
 0x272   :  { %2170 = vmatpush1.bf16.msra.mxu0 %v3243_v26 }
 0x273   :  { %2941 = vmatpush3.bf16.msra.mxu1 %v3247_v27  ;;  %2171 = vmatprep.subr.bf16.mxu0 %v3250_v28 }
 0x274   :  { %2942 = vmatprep.subr.bf16.mxu1 %v3251_v29 }
 0x276   :  { %2172 = vmatpush2.bf16.msra.mxu0 %v3248_v30 }
 0x277   :  { %2943 = vmatpush3.bf16.msra.mxu1 %v3252_v31  ;;  %2173 = vmatprep.subr.bf16.mxu0 %v3255_v32 }
 0x278   :  { %2944 = vmatprep.subr.bf16.mxu1 %v3256_v33 }
 0x27a   :  { %2174 = vmatpush2.bf16.msra.mxu0 %v3253_v34 }
 0x27b   :  { %2945 = vmatpush3.bf16.msra.mxu1 %v3257_v35  ;;  %2175 = vmatprep.subr.bf16.mxu0 %v3260_v36 }
 0x27c   :  { %2980 = vmatprep.subr.bf16.mxu1 %v3328_v42 }
 0x27e   :  { %2270 = vmatmul.mubr.bf16.vlgmr.msra.gmra.mxu1 %v959_v38  ;;  %2176 = vmatpush2.bf16.msra.mxu0 %v3258_v39  ;;  %v2317_v39 = vld [vmem:[%s4150_s8] sm:$0x7] }
 0x27f   :  { %2981 = vmatpush3.bf16.msra.mxu1 %v3261_v40  ;;  %2177 = vmatprep.subr.bf16.mxu0 %v3264_v43  ;;  %v2326_v18 = vrot.slane %v2317_v39, %v4022_v21  ;;  %v2842_v21 = vld [vmem:[%s4152_s10] ss:$0 sm:$0xff]  ;;  %s3330_s10 = smov [#allocation5]  }
 0x280   :  { %2982 = vmatprep.subr.bf16.mxu1 %v3328_v42  ;;  %2984 = vmatprep.mubr.msk.bf16.mxu1 %vm3329_vm2, %v3328_v42  ;;  %s2596_s14 = sshll.u32 %s3330_s10, 4  ;;  %s2597_s14 = int_to_ptr.vmem [resolvable:$true] %s2596_s14 }
 0x281   :  { %s3300_s15 = scalar_lea.vmem %s2597_s14, 32  ;;  %p3305_p1 = scmp.lt.s32.totalorder %s2597_s14, %s2597_s14 }
 0x282   :  { %2178 = vmatpush2.bf16.msra.mxu0 %v3262_v44  ;;  %v2330_v44 = vrot.slane %v2317_v39, %v606_v37  ;;  %p3301_p0 = scmp.ne.s32.totalorder %s2597_s14, %s3300_s15  ;;  %p3306_p2 = scmp.lt.s32.totalorder %s3300_s15, %s3300_s15 }
 0x283   :  { %2983 = vmatpush3.bf16.msra.mxu1 %v3265_v47  ;;  %2179 = vmatprep.subr.bf16.mxu0 %v3268_v48 }
 0x284   :  { %2988 = vmatprep.subr.bf16.mxu1 %v3328_v42  ;;  %p3307_p3 = por %p3306_p2, %p3305_p1 }
 0x286   :  { %2985 = vmatmul.mubr.msk.bf16.vlgmr.msra.gmra.mxu1 %vm2151_vm1, %v4062_v7  ;;  %2180 = vmatpush2.bf16.msra.mxu0 %v3266_v41  ;;  %v3292_v7 = vld [vmem:[%s4151_s9 + $0x48] sm:$0xff]   ;;  %p3308_p4 = pnand %p3307_p3, %p3301_p0 }
 0x287   :  { %2992 = vmatprep.mubr.msk.bf16.mxu1 %vm3329_vm2, %v3328_v42  ;;  %2181 = vmatprep.subr.bf16.mxu0 %v3271_v45 }
 0x288   :  { %2989 = vmatpush3.bf16.msra.mxu1 %v3281_v60 }
 0x289   :  { %2990 = vmatprep.subr.bf16.mxu1 %v3328_v42 }
 0x28a   :  { %2182 = vmatpush2.bf16.msra.mxu0 %v3269_v49 }
 0x28b   :  { %2183 = vmatprep.subr.bf16.mxu0 %v3274_v52 }
 0x28c   :  { %2991 = vmatpush3.bf16.msra.mxu1 %v3284_v63 }
 0x28e   :  { %2184 = vmatpush2.bf16.msra.mxu0 %v3272_v53 }
 0x28f   :  { %2185 = vmatprep.subr.bf16.mxu0 %v3277_v55 }
 0x292   :  { %2186 = vmatpush2.bf16.msra.mxu0 %v3275_v56 }
 0x293   :  { %2955 = vmatprep.subr.bf16.mxu0 %v3278_v57 }
 0x295   :  { %2188 = vmatmul.mubr.bf16.vlgmr.msra.gmra.mxu0 %v959_v38 }
 0x296   :  { %2956 = vmatpush3.bf16.msra.mxu0 %v3279_v58  ;;  %v2322_v58 = vrot.slane %v2317_v39, %v4016_v19 }
 0x297   :  { %2957 = vmatprep.subr.bf16.mxu0 %v3280_v59 }
 0x29a   :  { %2958 = vmatpush3.bf16.msra.mxu0 %v3282_v61 }
 0x29b   :  { %2959 = vmatprep.subr.bf16.mxu0 %v3283_v62 }
 0x29e   :  { %2960 = vmatpush3.bf16.msra.mxu0 %v3285_v0 }
 0x29f   :  { %2961 = vmatprep.subr.bf16.mxu0 %v3286_v1 }
 0x2a2   :  { %2962 = vmatpush3.bf16.msra.mxu0 %v3287_v2 }
 0x2a3   :  { %2963 = vmatprep.subr.bf16.mxu0 %v3288_v3 }
 0x2a6   :  { %2964 = vmatpush3.bf16.msra.mxu0 %v3289_v4 }
 0x2a7   :  { %2965 = vmatprep.subr.bf16.mxu0 %v3290_v5 }
 0x2aa   :  { %2966 = vmatpush3.bf16.msra.mxu0 %v3291_v6 }
 0x2ab   :  { %2967 = vmatprep.subr.bf16.mxu0 %v3292_v7 }
 0x2ae   :  { %2968 = vmatpush3.bf16.msra.mxu0 %v3293_v8 }
 0x2af   :  { %2969 = vmatprep.subr.bf16.mxu0 %v3294_v46 }
 0x2b2   :  { %2970 = vmatpush3.bf16.msra.mxu0 %v3295_v50 }
 0x2f5   :  { %v1735_v9 = vpop.f32.mrf.mxu0 }
 0x2f6   :  { %v1776_v24 = vpop.f32.mrf.mxu1 }
 0x2f7   :  { %v1777_v10 = vadd.f32 %v1776_v24, %v1735_v9  ;;  %v1737_v51 = vpop.f32.mrf.mxu0 }
 0x2f8   :  { %v1778_v54 = vpop.f32.mrf.mxu1 }
 0x2f9   :  { %v1779_v11 = vadd.f32 %v1778_v54, %v1737_v51  ;;  %v1739_v12 = vpop.f32.mrf.mxu0 }
 0x2fa   :  { %v1780_v13 = vpop.f32.mrf.mxu1 }
 0x2fb   :  { %v1740_v14 = vpop.f32.mrf.mxu0 }
 0x2fc   :  { %v1781_v15 = vpop.f32.mrf.mxu1 }
 0x315   :  { %v2902_v16 = vpop.f32.mrf.mxu0 }
 0x316   :  { %v2924_v17 = vpop.f32.mrf.mxu1 }
 0x317   :  { %v2903_v20 = vpop.f32.mrf.mxu0 }
 0x318   :  { %v2925_v22 = vpop.f32.mrf.mxu1  ;;  %v2904_v33 = vadd.f32 %v2903_v20, %v2902_v16 }
 0x319   :  { %v2905_v23 = vpop.f32.mrf.mxu0  ;;  %v2926_v34 = vadd.f32 %v2925_v22, %v2924_v17 }
 0x31a   :  { %v2927_v25 = vpop.f32.mrf.mxu1 }
 0x31b   :  { %v2906_v26 = vpop.f32.mrf.mxu0  ;;  %v1858_v40 = vadd.f32 %v2926_v34, %v2904_v33 }
 0x31c   :  { %v2928_v27 = vpop.f32.mrf.mxu1 }
 0x31e   :  { %v2230_v28 = vpop.f32.mrf.mxu1 }
 0x320   :  { %v2232_v29 = vpop.f32.mrf.mxu1 }
 0x322   :  { %v2234_v30 = vpop.f32.mrf.mxu1 }
 0x324   :  { %v2235_v31 = vpop.f32.mrf.mxu1 }
 0x33e   :  { %v2946_v32 = vpop.f32.mrf.mxu1 }
 0x340   :  { %v2947_v35 = vpop.f32.mrf.mxu1 }
 0x341   :  { %v2948_v36 = vadd.f32 %v2947_v35, %v2946_v32 }
 0x342   :  { %v2949_v38 = vpop.f32.mrf.mxu1 }
 0x343   :  { %v2272_v43 = vadd.f32 %v2948_v36, %v1858_v40 }
 0x344   :  { %v2950_v42 = vpop.f32.mrf.mxu1 }
 0x346   :  { %v2311_v47 = vpop.f32.mrf.mxu1 }
 0x347   :  { %v2312_v48 = vadd.f32 %v2311_v47, %v2272_v43 }
 0x348   :  { %v2986_v41 = vpop.f32.mrf.mxu1 }
 0x349   :  { %v2336_v45 = vadd.f32 %v2330_v44, %v2312_v48 }
 0x34a   :  { %v2314_v49 = vpop.f32.mrf.mxu1 }
 0x34b   :  { %v2339_v52 = vmax.f32 %v2336_v45, 0.0 }
 0x34c   :  { %v2987_v53 = vpop.f32.mrf.mxu1 }
 0x34d   :  { %v2342_v55 = vpack.c.bf16 %v2339_v52, %v2339_v52 }
 0x34f   :  { %2993 = vmatmul.mubr.msk.bf16.vlgmr.msra.gmra.mxu1 %vm2151_vm1, %v2342_v55 }
 0x355   :  { %v2189_v56 = vpop.f32.mrf.mxu0 }
 0x356   :  { %v2190_v57 = vadd.f32 %v2189_v56, %v1777_v10 }
 0x357   :  { %v2191_v59 = vpop.f32.mrf.mxu0 }
 0x358   :  { %v2231_v60 = vadd.f32 %v2230_v28, %v2190_v57  ;;  %v2192_v61 = vadd.f32 %v2191_v59, %v1779_v11 }
 0x359   :  { %v2193_v37 = vpop.f32.mrf.mxu0 }
 0x35a   :  { %v2334_v62 = vadd.f32 %v2322_v58, %v2231_v60  ;;  %v2233_v63 = vadd.f32 %v2232_v29, %v2192_v61 }
 0x35b   :  { %v2194_v0 = vpop.f32.mrf.mxu0 }
 0x35c   :  { %v2335_v1 = vadd.f32 %v2326_v18, %v2233_v63  ;;  %v2337_v2 = vmax.f32 %v2334_v62, 0.0 }
 0x35e   :  { %v2338_v3 = vmax.f32 %v2335_v1, 0.0  ;;  %v2340_v5 = vpack.c.bf16 %v2337_v2, %v2337_v2 }
 0x360   :  { %v2341_v4 = vpack.c.bf16 %v2338_v3, %v2338_v3 }
 0x362   :  { %2529 = vmatprep.mubr.bf16.mxu0 %v2341_v4 }
 0x363   :  { %2530 = vmatmul.mubr.bf16.vlgmr.msra.gmra.mxu0 %v2340_v5 }
 0x40f   :  { %v2571_v6 = vpop.f32.mrf.mxu1 }
 0x411   :  { %v2994_v7 = vpop.f32.mrf.mxu1 }
 0x413   :  { %v2574_v8 = vpop.f32.mrf.mxu1 }
 0x415   :  { %v2995_v19 = vpop.f32.mrf.mxu1 }
 0x423   :  { %v2971_v46 = vpop.f32.mrf.mxu0 }
 0x425   :  { %v2972_v50 = vpop.f32.mrf.mxu0 }
 0x426   :  { %v2973_v9 = vadd.f32 %v2972_v50, %v2971_v46 }
 0x427   :  { %v2974_v24 = vpop.f32.mrf.mxu0 }
 0x428   :  { %v2532_v10 = vadd.f32 %v2973_v9, %v2842_v21 }
 0x429   :  { %v2975_v51 = vpop.f32.mrf.mxu0 }
 0x42a   :  { %v2572_v54 = vadd.f32 %v2571_v6, %v2532_v10 }
 0x42c   :  { %v2578_v11 = vsel %vm2577_vm3, %v2572_v54, -inf }
 0x42d   :  { %2579 = vmax.xlane.f32.xlu0 %v2578_v11 }
 0x4b6   :  { %v2580_v12 = vpop.xlane.xlu0 %2579 }
 0x4b7   :  { %v2581_v13 = vsub.f32 %v2572_v54, %v2580_v12 }
 0x4b9   :  { %v2582_v14 = vmul.f32 1.442695, %v2581_v13 }
 0x4bb   :  { %3296 = vpow2.f32 %v2582_v14 }
 0x4c8   :  { %v3297_v15 = vpop.eup %3296 }
 0x4c9   :  { %v2584_v16 = vsel %vm2577_vm3, %v3297_v15, 0.0 }
 0x4ca   :  { %2585 = vadd.xlane.f32.xlu0 %v2584_v16 }
 0x553   :  { %v2586_v17 = vpop.xlane.xlu0 %2585 }
 0x554   :  { %3298 = vrcp.f32 %v2586_v17 }
 0x561   :  { %v3299_v20 = vpop.eup %3298 }
 0x562   :  { %v2588_v22 = vmul.f32 %v3299_v20, %v3297_v15 }
 0x564   :  { %2589 = vst.msk [vmem:[#allocation5] sm:$0x3] %vm2577_vm3, %v2588_v22 }
 0x565   :  { %3311 = shalt.err (!%p3308_p4)
}
 0x566   :  { %2599 = dma.vmem_to_hbm [thread:$0]  %s2597_s14, 32, %s4153_s11, [#allocation6]  }
 0x567   :  { %3324 = dma.done.wait [#allocation6], 32  }
 0x568   :  { %3325 = vsyncadd [#allocation6], 4294967264 }
 0x569   :  { %2603 = vsyncpa [#allocation6], 1 }
 0x56a   :  { %2604 = vsyncmov [#allocation4] }
 0x56d   :  { %s2605_s18 = vpop.sfrf %2604 }
 0x56e   :  { %p2862_p5 = scmp.ne.s32.totalorder %s2605_s18, 0 }
 0x570   :  { %2609 = shalt.err (%p2862_p5)  }
 0x571   :  { %2611 = vsyncmov [#allocation4 + $0x1] }
 0x574   :  { %s2612_s6 = vpop.sfrf %2611 }
 0x575   :  { %p2863_p6 = scmp.ne.s32.totalorder %s2612_s6, 0 }
 0x577   :  { %2616 = shalt.err (%p2863_p6)  }

</bundles_post_ra>
